<compile_context>
chip_gen: v6e
topology: v6e:2x2x1
jax: 0.10.0
libtpu: 0.0.40
codegen_flags: <defaults>
</compile_context>

<pallas_src>
import functools
import random

import jax
import jax.numpy as jnp
from jax.experimental import pallas as pl
from jax.experimental.pallas import tpu as pltpu

C_IN, H, W = 256, 7, 7       # input channels, height (j/m axis), width (l/n axis)
C_OUT = 512
KH = 3                        # conv taps along the width axis
H_PAD = 8                     # h rows per p-block, padded 7 -> 8 for (8,128) alignment
W_PAD = W + 2                 # width padded by 1 on each side for the 3-tap conv
P_PAD = W * H_PAD             # 56 output rows, p-major: row = p * 8 + h
LHS_ROWS = W_PAD * H_PAD      # 72 LHS rows: row = w_padded * 8 + h


def _num_output_blocks():
    """Grid size over output-channel halves.

    Use 2 blocks (sharded across TensorCores via dimension_semantics="parallel")
    only where one Pallas kernel sees 2 TCs (v7x, v4 megacore).  On single-TC
    v5e / v6e a 2-step grid is just a serial loop with ~0.35 us per-step
    overhead and no useful overlap, so use a single full-width block there.
    """
    try:
        kind = jax.devices()[0].device_kind.lower()
    except Exception:
        return 1
    if "v7" in kind or "7x" in kind or "v4" in kind:
        return 2
    return 1


def _kernel(x_ref, w2_ref, w1_ref, y_ref, *, roll_shift, a_idx):
    # x_ref:  (72, 256)   rows = (w_padded, h_padded), channels lane-dense
    # w2_ref: (3, 256, N) per-tap weights, out-channels lane-dense
    # w1_ref: (2, N)
    # y_ref:  (56, N)     rows = (p, h_padded)
    #
    # Three accumulated MXU passes, one per width tap.  Each tap's LHS is a
    # static sublane window of the same slab starting at a multiple of 8, so
    # no unfolded (56, 768) temporary is ever built.
    u = jnp.dot(x_ref[0:P_PAD, :], w2_ref[0],
                preferred_element_type=jnp.float32)
    u = u + jnp.dot(x_ref[H_PAD:H_PAD + P_PAD, :], w2_ref[1],
                    preferred_element_type=jnp.float32)
    u = u + jnp.dot(x_ref[2 * H_PAD:2 * H_PAD + P_PAD, :], w2_ref[2],
                    preferred_element_type=jnp.float32)
    # The module's roll/pair-sum over the doubled width axis reduces to adding
    # a p-block-rotated copy of u scaled by the other w1 column.  Rows are
    # p-major with 8 (padded) h rows per block, so the rotation is by a
    # multiple of 8 sublanes: a whole-vreg sublane-group rotate on the XLU
    # (equivalent to concatenating the two 8-aligned row ranges).
    u_perm = pltpu.roll(u, roll_shift, axis=0)
    w_a = w1_ref[a_idx:a_idx + 1, :]          # (1, N), sublane-broadcast
    w_b = w1_ref[1 - a_idx:2 - a_idx, :]
    y_ref[...] = u * w_a + u_perm * w_b


def prepare_weights(w1, w2):
    """One-time weight re-layout (call at weight-load/init time, NOT per step).

    w2 (512, 3, 256) -> (3, 256, 512): per-tap (contraction, out-channel) with
    out-channels lane-dense, so the kernel needs no transpose and the per-call
    path never re-materializes a transposed ~1.5 MB weight.
    w1 (512, 2) -> (2, 512).
    """
    w2p = jnp.transpose(w2, (1, 2, 0))
    w1t = jnp.transpose(w1)
    return w1t, w2p


def _build_pallas_fn(n_blocks, roll_shift, a_idx):
    n_blk = C_OUT // n_blocks
    grid_spec = pltpu.PrefetchScalarGridSpec(
        num_scalar_prefetch=0,
        grid=(n_blocks,),
        in_specs=[
            pl.BlockSpec((LHS_ROWS, C_IN), lambda i: (0, 0)),       # LHS slab (shared)
            pl.BlockSpec((KH, C_IN, n_blk), lambda i: (0, 0, i)),   # w2 taps, per-half
            pl.BlockSpec((2, n_blk), lambda i: (0, i)),             # w1, per-half
        ],
        out_specs=pl.BlockSpec((P_PAD, n_blk), lambda i: (0, i)),
    )
    cost = pl.CostEstimate(
        flops=2 * P_PAD * KH * C_IN * C_OUT,
        transcendentals=0,
        bytes_accessed=4 * (LHS_ROWS * C_IN + KH * C_IN * C_OUT
                            + 2 * C_OUT + P_PAD * C_OUT),
    )
    return pl.pallas_call(
        functools.partial(_kernel, roll_shift=roll_shift, a_idx=a_idx),
        out_shape=jax.ShapeDtypeStruct((P_PAD, C_OUT), jnp.float32),
        grid_spec=grid_spec,
        compiler_params=pltpu.CompilerParams(
            dimension_semantics=("parallel",)),
        cost_estimate=cost,
    )


@functools.partial(jax.jit, static_argnames=("shift", "n_blocks"))
def kernel_generated_5_forward(x, w1t, w2p, *, shift, n_blocks):
    """Forward pass.  `w1t, w2p = prepare_weights(w1, w2)` must be done once at init.

    `shift` is the module's shift_direction (+1 / -1), fixed at module init, so
    it is a static argument: the p-block rotation and w1 column order are baked
    in at trace time (if it ever becomes a traced value this forces a retrace).
    """
    assert shift in (1, -1)
    roll_shift = (H_PAD * shift) % P_PAD      # +1 -> 8, -1 -> 48 (multiples of 8)
    a_idx = 0 if shift == 1 else 1

    # ---- LHS prep: pure index plumbing, fused by XLA under this jit ---------
    #   lhs[(w + 1) * 8 + h, c] = x[0, c, (h - shift) % 7, w]
    # zero rows at w_padded in {0, 8} (conv padding) and at h == 7 (alignment).
    xr = jnp.roll(x[0], shift, axis=1)                # final height-roll, pre-applied
    xh = jnp.transpose(xr, (2, 1, 0))                 # (W, H, C) = (7, 7, 256)
    xh = jnp.pad(xh, ((1, 1), (0, 1), (0, 0)))        # (9, 8, 256)
    lhs = xh.reshape(LHS_ROWS, C_IN)

    yt = _build_pallas_fn(n_blocks, roll_shift, a_idx)(lhs, w2p, w1t)

    # yt rows are (p, h_padded); drop the pad rows and restore (1, C_out, p, h).
    # TODO(synk): if the consumer can take the lane-dense (p, h, C_out) layout,
    # drop this transpose (one fewer launch on a ~100 KB tensor).
    y = yt.reshape(W, H_PAD, C_OUT)[:, :H, :]
    return jnp.transpose(y, (2, 0, 1))[None]


def reference_forward(x, w1, w2, shift):
    """Literal jnp transcription of the PyTorch forward (validation only)."""
    t3 = jnp.einsum('ikjl->ilkj', x)
    t3 = t3.reshape(1, 1, 7, 1792)
    pad = jnp.pad(t3, ((0, 0), (0, 0), (1, 1), (0, 0)))
    cols = jnp.stack([pad[:, 0, kh:kh + 7, :] for kh in range(3)], axis=1)
    t3 = cols.reshape(1, 3, 7, 256, 7)
    t4 = jnp.einsum('lknjm,ikj->linm', t3, w2)
    t5 = jnp.einsum('kiml,ij->kimjl', t4, w1)
    t6 = t5.reshape(1, 512, 14, 7)
    t6 = jnp.roll(t6, shift, axis=2)
    t6 = t6.reshape(1, 512, 7, 2, 7).sum(axis=3)
    return jnp.roll(t6, shift, axis=3)


if __name__ == "__main__":
    # Deterministic stand-in for the module's random shift_direction.
    random.seed(0)
    module_shift = int((random.random() > 0.5) * 2 - 1)     # -> +1

    key = jax.random.PRNGKey(0)
    kx, k1, k2 = jax.random.split(key, 3)
    # The forward hard-codes these shapes (reshape to (1, 1, 7, 1792) etc.).
    x = jax.random.normal(kx, (1, C_IN, H, W), dtype=jnp.float32)
    w1 = jax.random.normal(k1, (C_OUT, 2), dtype=jnp.float32)            # weights[0]
    w2 = jax.random.normal(k2, (C_OUT, KH, C_IN), dtype=jnp.float32)     # weights[1]

    # One-time weight prep (init / weight-load time, outside the per-call path).
    w1t, w2p = prepare_weights(w1, w2)
    w1t = jax.block_until_ready(w1t)
    w2p = jax.block_until_ready(w2p)

    n_blocks = _num_output_blocks()

    # Check both possible shift directions (the module picks one at init time).
    for shift in (module_shift, -module_shift):
        y = kernel_generated_5_forward(x, w1t, w2p, shift=shift, n_blocks=n_blocks)
        y = jax.block_until_ready(y)
        assert y.shape == (1, C_OUT, 7, 7)

        y_ref = reference_forward(x, w1, w2, shift)
        max_err = float(jnp.max(jnp.abs(y - y_ref)))
        assert jnp.allclose(y, y_ref, rtol=1e-2, atol=1e-1), (
            f"shift={shift}: max abs err {max_err}")

    print("KERNEL_OK")
</pallas_src>

<mosaic_0001>
module attributes {stable_mosaic.version = 11 : i64} {
  func.func @_kernel(%arg0: i32, %arg1: memref<72x256xf32, #tpu.memory_space<vmem>>, %arg2: memref<3x256x512xf32, #tpu.memory_space<vmem>>, %arg3: memref<2x512xf32, #tpu.memory_space<vmem>>, %arg4: memref<56x512xf32, #tpu.memory_space<vmem>>) attributes {dimension_semantics = [#tpu.dimension_semantics<parallel>], iteration_bounds = array<i64: 1>, scalar_prefetch = 0 : i64, scratch_operands = 0 : i64, tpu.core_type = #tpu.core_type<tc>, window_params = [{pipeline_mode = #tpu.pipeline_mode<synchronous>, transform_indices = @transform_0, window_bounds = array<i64: 72, 256>}, {transform_indices = @transform_1, window_bounds = array<i64: 3, 256, 512>}, {transform_indices = @transform_2, window_bounds = array<i64: 2, 512>}, {transform_indices = @transform_3, window_bounds = array<i64: 56, 512>}]} {
    %c0 = arith.constant 0 : index
    %c0_0 = arith.constant 0 : index
    %0 = vector.load %arg1[%c0, %c0_0] : memref<72x256xf32, #tpu.memory_space<vmem>>, vector<56x256xf32>
    %c0_1 = arith.constant 0 : index
    %c0_2 = arith.constant 0 : index
    %c0_3 = arith.constant 0 : index
    %1 = vector.load %arg2[%c0_1, %c0_2, %c0_3] : memref<3x256x512xf32, #tpu.memory_space<vmem>>, vector<1x256x512xf32>
    %2 = vector.shape_cast %1 : vector<1x256x512xf32> to vector<256x512xf32>
    %cst = arith.constant dense<0.000000e+00> : vector<56x512xf32>
    %3 = tpu.matmul %0, %2, %cst {dimension_numbers = #tpu.dot_dimension_numbers<[1], [0], [0], [1], [0, 0, 1, 1], [], []>} : vector<56x256xf32>, vector<256x512xf32>, vector<56x512xf32> -> vector<56x512xf32>
    %c8 = arith.constant 8 : index
    %c0_4 = arith.constant 0 : index
    %4 = vector.load %arg1[%c8, %c0_4] : memref<72x256xf32, #tpu.memory_space<vmem>>, vector<56x256xf32>
    %c1 = arith.constant 1 : index
    %c0_5 = arith.constant 0 : index
    %c0_6 = arith.constant 0 : index
    %5 = vector.load %arg2[%c1, %c0_5, %c0_6] : memref<3x256x512xf32, #tpu.memory_space<vmem>>, vector<1x256x512xf32>
    %6 = vector.shape_cast %5 : vector<1x256x512xf32> to vector<256x512xf32>
    %cst_7 = arith.constant dense<0.000000e+00> : vector<56x512xf32>
    %7 = tpu.matmul %4, %6, %cst_7 {dimension_numbers = #tpu.dot_dimension_numbers<[1], [0], [0], [1], [0, 0, 1, 1], [], []>} : vector<56x256xf32>, vector<256x512xf32>, vector<56x512xf32> -> vector<56x512xf32>
    %8 = arith.addf %3, %7 : vector<56x512xf32>
    %c16 = arith.constant 16 : index
    %c0_8 = arith.constant 0 : index
    %9 = vector.load %arg1[%c16, %c0_8] : memref<72x256xf32, #tpu.memory_space<vmem>>, vector<56x256xf32>
    %c2 = arith.constant 2 : index
    %c0_9 = arith.constant 0 : index
    %c0_10 = arith.constant 0 : index
    %10 = vector.load %arg2[%c2, %c0_9, %c0_10] : memref<3x256x512xf32, #tpu.memory_space<vmem>>, vector<1x256x512xf32>
    %11 = vector.shape_cast %10 : vector<1x256x512xf32> to vector<256x512xf32>
    %cst_11 = arith.constant dense<0.000000e+00> : vector<56x512xf32>
    %12 = tpu.matmul %9, %11, %cst_11 {dimension_numbers = #tpu.dot_dimension_numbers<[1], [0], [0], [1], [0, 0, 1, 1], [], []>} : vector<56x256xf32>, vector<256x512xf32>, vector<56x512xf32> -> vector<56x512xf32>
    %13 = arith.addf %8, %12 : vector<56x512xf32>
    %c8_i32 = arith.constant 8 : i32
    %14 = tpu.dynamic_rotate %13 by %c8_i32 dim 0 : vector<56x512xf32>, i32 -> vector<56x512xf32>
    %c0_12 = arith.constant 0 : index
    %c0_13 = arith.constant 0 : index
    %15 = vector.load %arg3[%c0_12, %c0_13] : memref<2x512xf32, #tpu.memory_space<vmem>>, vector<1x512xf32>
    %c1_14 = arith.constant 1 : index
    %c0_15 = arith.constant 0 : index
    %16 = vector.load %arg3[%c1_14, %c0_15] : memref<2x512xf32, #tpu.memory_space<vmem>>, vector<1x512xf32>
    %17 = vector.broadcast %15 : vector<1x512xf32> to vector<56x512xf32>
    %18 = arith.mulf %13, %17 : vector<56x512xf32>
    %19 = vector.broadcast %16 : vector<1x512xf32> to vector<56x512xf32>
    %20 = arith.mulf %14, %19 : vector<56x512xf32>
    %21 = arith.addf %18, %20 : vector<56x512xf32>
    %c0_16 = arith.constant 0 : index
    %c0_17 = arith.constant 0 : index
    %22 = vector.load %arg4[%c0_16, %c0_17] : memref<56x512xf32, #tpu.memory_space<vmem>>, vector<56x512xf32>
    tpu.vector_store %arg4[%c0_16, %c0_17], %21 {strides = array<i32>} : memref<56x512xf32, #tpu.memory_space<vmem>>, vector<56x512xf32>,
    return
  }
  func.func @transform_0(%arg0: i32) -> (i32, i32) {
    %c0_i32 = arith.constant 0 : i32
    %c0_i32_0 = arith.constant 0 : i32
    %c0_i32_1 = arith.constant 0 : i32
    return %c0_i32, %c0_i32_0 : i32, i32
  }
  func.func @transform_1(%arg0: i32) -> (i32, i32, i32) {
    %c0_i32 = arith.constant 0 : i32
    %c0_i32_0 = arith.constant 0 : i32
    %c0_i32_1 = arith.constant 0 : i32
    return %c0_i32, %c0_i32_0, %arg0 : i32, i32, i32
  }
  func.func @transform_2(%arg0: i32) -> (i32, i32) {
    %c0_i32 = arith.constant 0 : i32
    %c0_i32_0 = arith.constant 0 : i32
    return %c0_i32, %arg0 : i32, i32
  }
  func.func @transform_3(%arg0: i32) -> (i32, i32) {
    %c0_i32 = arith.constant 0 : i32
    %c0_i32_0 = arith.constant 0 : i32
    return %c0_i32, %arg0 : i32, i32
  }
}

</mosaic_0001>

<bundles_post_ra>
// kernel: kernel_generated_5_forward.1
= control target key start
LH: loop header
LB: loop body
LE: loop exit
PB: predicated region body
PF: predicated region fallthrough
CT: control target
= control target key end

     0   :  { %8 = vsyncpa [#allocation3], 0  ;;  %s1831_s0 = inlined_call_operand.vmem [shape: f32[72,256], index: 0, kind: input, shape index: {}]   ;;  %s1832_s1 = inlined_call_operand.hbm [shape: f32[3,256,512], index: 1, kind: input, shape index: {}]   ;;  %s1833_s2 = inlined_call_operand.hbm [shape: f32[2,512], index: 2, kind: input, shape index: {}]   ;;  %s1834_s3 = inlined_call_operand.vmem [shape: f32[56,512], index: 3, kind: output, shape index: {}]  }
   0x1   :  { %9 = vsyncpa [#allocation5], 0  ;;  %s1337_s12 = smov [#allocation2]  }
   0x2   :  { %s17_s13 = sshll.u32 %s1337_s12, 4  ;;  %s18_s13 = int_to_ptr.vmem [resolvable:$true] %s17_s13 }
   0x3   :  { %s1301_s14 = scalar_lea.vmem %s18_s13, 49152  ;;  %p1306_p1 = scmp.lt.s32.totalorder %s18_s13, %s18_s13 }
   0x4   :  { %p1302_p0 = scmp.ne.s32.totalorder %s18_s13, %s1301_s14  ;;  %p1307_p2 = scmp.lt.s32.totalorder %s1301_s14, %s1301_s14 }
   0x6   :  { %p1308_p3 = por %p1307_p2, %p1306_p1 }
   0x8   :  { %p1309_p4 = pnand %p1308_p3, %p1302_p0 }
   0xa   :  { %1312 = shalt.err (!%p1309_p4)
}
   0xb   :  { %s1338_s15 = smov 512   ;;  %s1339_s16 = smov 32  }
   0xc   :  { %23 = dma.hbm_to_vmem [thread:$0]  %s1832_s1, 49152, %s18_s13, [#allocation3], %s1338_s15, %s1338_s15, %s1339_s16  }
   0xd   :  { %s1340_s19 = smov [#allocation4]  }
   0xe   :  { %s30_s20 = sshll.u32 %s1340_s19, 4  ;;  %s31_s20 = int_to_ptr.vmem [resolvable:$true] %s30_s20 }
   0xf   :  { %s1321_s21 = scalar_lea.vmem %s31_s20, 128  ;;  %p1326_p6 = scmp.lt.s32.totalorder %s31_s20, %s31_s20 }
  0x10   :  { %p1322_p5 = scmp.ne.s32.totalorder %s31_s20, %s1321_s21  ;;  %p1327_p7 = scmp.lt.s32.totalorder %s1321_s21, %s1321_s21 }
  0x12   :  { %p1328_p8 = por %p1327_p7, %p1326_p6 }
  0x14   :  { %p1329_p9 = pnand %p1328_p8, %p1322_p5 }
  0x16   :  { %1332 = shalt.err (!%p1329_p9)
}
  0x17   :  { %33 = dma.hbm_to_vmem [thread:$0]  %s1833_s2, 128, %s31_s20, [#allocation5]  }
  0x18   :  { %1333 = dma.done.wait [#allocation3], 49152  }
  0x19   :  { %1334 = vsyncadd [#allocation3], 4294918144 }
  0x1a   :  { %1335 = dma.done.wait [#allocation5], 128  }
  0x1b   :  { %1336 = vsyncadd [#allocation5], 4294967168  ;;  %v246_v0 = vld [vmem:[#allocation2 + $0x5e8] sm:$0xff]  ;;  %v248_v1 = vld [vmem:[#allocation2 + $0x5f8] sm:$0xff] }
  0x1c   :  { %v245_v2 = vld [vmem:[#allocation2 + $0x5e0] sm:$0xff]  ;;  %313 = vmatprep.subr.mxu0 %v246_v0  ;;  %420 = vmatprep.subr.mxu1 %v248_v1  ;;  %v247_v3 = vld [vmem:[#allocation2 + $0x5f0] sm:$0xff]  ;;  %v242_v4 = vld [vmem:[#allocation2 + $0x5c8] sm:$0xff] }
  0x1d   :  { %v244_v5 = vld [vmem:[#allocation2 + $0x5d8] sm:$0xff]  ;;  %314 = vmatpush1.msra.mxu0 %v245_v2  ;;  %421 = vmatpush1.msra.mxu1 %v247_v3  ;;  %v241_v6 = vld [vmem:[#allocation2 + $0x5c0] sm:$0xff]  ;;  %v243_v7 = vld [vmem:[#allocation2 + $0x5d0] sm:$0xff] }
  0x1e   :  { %v238_v8 = vld [vmem:[#allocation2 + $0x5a8] sm:$0xff]  ;;  %315 = vmatprep.subr.mxu0 %v242_v4  ;;  %422 = vmatprep.subr.mxu1 %v244_v5  ;;  %v240_v9 = vld [vmem:[#allocation2 + $0x5b8] sm:$0xff]  ;;  %v237_v10 = vld [vmem:[#allocation2 + $0x5a0] sm:$0xff] }
  0x1f   :  { %v239_v11 = vld [vmem:[#allocation2 + $0x5b0] sm:$0xff]  ;;  %316 = vmatpush1.msra.mxu0 %v241_v6  ;;  %423 = vmatpush1.msra.mxu1 %v243_v7  ;;  %v234_v12 = vld [vmem:[#allocation2 + $0x588] sm:$0xff]  ;;  %v236_v13 = vld [vmem:[#allocation2 + $0x598] sm:$0xff] }
  0x20   :  { %317 = vmatprep.subr.mxu0 %v238_v8  ;;  %424 = vmatprep.subr.mxu1 %v240_v9  ;;  %v233_v14 = vld [vmem:[#allocation2 + $0x580] sm:$0xff]  ;;  %v235_v15 = vld [vmem:[#allocation2 + $0x590] sm:$0xff]  ;;  %v230_v16 = vld [vmem:[#allocation2 + $0x568] sm:$0xff] }
  0x21   :  { %318 = vmatpush1.msra.mxu0 %v237_v10  ;;  %425 = vmatpush1.msra.mxu1 %v239_v11  ;;  %v232_v17 = vld [vmem:[#allocation2 + $0x578] sm:$0xff]  ;;  %v229_v18 = vld [vmem:[#allocation2 + $0x560] sm:$0xff]  ;;  %v231_v19 = vld [vmem:[#allocation2 + $0x570] sm:$0xff] }
  0x22   :  { %319 = vmatprep.subr.mxu0 %v234_v12  ;;  %426 = vmatprep.subr.mxu1 %v236_v13  ;;  %v226_v20 = vld [vmem:[#allocation2 + $0x548] sm:$0xff]  ;;  %v228_v21 = vld [vmem:[#allocation2 + $0x558] sm:$0xff]  ;;  %v225_v22 = vld [vmem:[#allocation2 + $0x540] sm:$0xff] }
  0x23   :  { %320 = vmatpush1.msra.mxu0 %v233_v14  ;;  %427 = vmatpush1.msra.mxu1 %v235_v15  ;;  %v227_v23 = vld [vmem:[#allocation2 + $0x550] sm:$0xff]  ;;  %v222_v24 = vld [vmem:[#allocation2 + $0x528] sm:$0xff]  ;;  %v224_v25 = vld [vmem:[#allocation2 + $0x538] sm:$0xff] }
  0x24   :  { %321 = vmatprep.subr.mxu0 %v230_v16  ;;  %428 = vmatprep.subr.mxu1 %v232_v17  ;;  %v221_v26 = vld [vmem:[#allocation2 + $0x520] sm:$0xff]  ;;  %v223_v27 = vld [vmem:[#allocation2 + $0x530] sm:$0xff]  ;;  %v218_v28 = vld [vmem:[#allocation2 + $0x508] sm:$0xff] }
  0x25   :  { %322 = vmatpush1.msra.mxu0 %v229_v18  ;;  %429 = vmatpush1.msra.mxu1 %v231_v19  ;;  %v220_v29 = vld [vmem:[#allocation2 + $0x518] sm:$0xff]  ;;  %v217_v30 = vld [vmem:[#allocation2 + $0x500] sm:$0xff]  ;;  %v219_v31 = vld [vmem:[#allocation2 + $0x510] sm:$0xff] }
  0x26   :  { %323 = vmatprep.subr.mxu0 %v226_v20  ;;  %430 = vmatprep.subr.mxu1 %v228_v21  ;;  %v214_v32 = vld [vmem:[#allocation2 + $0x4e8] sm:$0xff]  ;;  %v216_v33 = vld [vmem:[#allocation2 + $0x4f8] sm:$0xff]  ;;  %v213_v34 = vld [vmem:[#allocation2 + $0x4e0] sm:$0xff] }
  0x27   :  { %324 = vmatpush1.msra.mxu0 %v225_v22  ;;  %431 = vmatpush1.msra.mxu1 %v227_v23  ;;  %v215_v35 = vld [vmem:[#allocation2 + $0x4f0] sm:$0xff]  ;;  %v210_v36 = vld [vmem:[#allocation2 + $0x4c8] sm:$0xff]  ;;  %v212_v37 = vld [vmem:[#allocation2 + $0x4d8] sm:$0xff] }
  0x28   :  { %325 = vmatprep.subr.mxu0 %v222_v24  ;;  %432 = vmatprep.subr.mxu1 %v224_v25  ;;  %v209_v38 = vld [vmem:[#allocation2 + $0x4c0] sm:$0xff]  ;;  %v211_v39 = vld [vmem:[#allocation2 + $0x4d0] sm:$0xff]  ;;  %v206_v40 = vld [vmem:[#allocation2 + $0x4a8] sm:$0xff] }
  0x29   :  { %326 = vmatpush1.msra.mxu0 %v221_v26  ;;  %433 = vmatpush1.msra.mxu1 %v223_v27  ;;  %v208_v41 = vld [vmem:[#allocation2 + $0x4b8] sm:$0xff]  ;;  %v205_v42 = vld [vmem:[#allocation2 + $0x4a0] sm:$0xff]  ;;  %v207_v43 = vld [vmem:[#allocation2 + $0x4b0] sm:$0xff] }
  0x2a   :  { %327 = vmatprep.subr.mxu0 %v218_v28  ;;  %434 = vmatprep.subr.mxu1 %v220_v29  ;;  %v202_v44 = vld [vmem:[#allocation2 + $0x488] sm:$0xff]  ;;  %v204_v45 = vld [vmem:[#allocation2 + $0x498] sm:$0xff]  ;;  %v201_v46 = vld [vmem:[#allocation2 + $0x480] sm:$0xff] }
  0x2b   :  { %328 = vmatpush1.msra.mxu0 %v217_v30  ;;  %435 = vmatpush1.msra.mxu1 %v219_v31  ;;  %v203_v47 = vld [vmem:[#allocation2 + $0x490] sm:$0xff]  ;;  %v198_v48 = vld [vmem:[#allocation2 + $0x468] sm:$0xff]  ;;  %v200_v49 = vld [vmem:[#allocation2 + $0x478] sm:$0xff] }
  0x2c   :  { %329 = vmatprep.subr.mxu0 %v214_v32  ;;  %436 = vmatprep.subr.mxu1 %v216_v33  ;;  %v197_v50 = vld [vmem:[#allocation2 + $0x460] sm:$0xff]  ;;  %v199_v51 = vld [vmem:[#allocation2 + $0x470] sm:$0xff]  ;;  %v194_v52 = vld [vmem:[#allocation2 + $0x448] sm:$0xff] }
  0x2d   :  { %330 = vmatpush1.msra.mxu0 %v213_v34  ;;  %437 = vmatpush1.msra.mxu1 %v215_v35  ;;  %v196_v53 = vld [vmem:[#allocation2 + $0x458] sm:$0xff]  ;;  %v193_v54 = vld [vmem:[#allocation2 + $0x440] sm:$0xff]  ;;  %v195_v55 = vld [vmem:[#allocation2 + $0x450] sm:$0xff] }
  0x2e   :  { %331 = vmatprep.subr.mxu0 %v210_v36  ;;  %438 = vmatprep.subr.mxu1 %v212_v37  ;;  %v190_v56 = vld [vmem:[#allocation2 + $0x428] sm:$0xff]  ;;  %v192_v57 = vld [vmem:[#allocation2 + $0x438] sm:$0xff]  ;;  %v189_v58 = vld [vmem:[#allocation2 + $0x420] sm:$0xff] }
  0x2f   :  { %332 = vmatpush1.msra.mxu0 %v209_v38  ;;  %439 = vmatpush1.msra.mxu1 %v211_v39  ;;  %v191_v59 = vld [vmem:[#allocation2 + $0x430] sm:$0xff]  ;;  %v186_v60 = vld [vmem:[#allocation2 + $0x408] sm:$0xff]  ;;  %v188_v61 = vld [vmem:[#allocation2 + $0x418] sm:$0xff] }
  0x30   :  { %333 = vmatprep.subr.mxu0 %v206_v40  ;;  %440 = vmatprep.subr.mxu1 %v208_v41  ;;  %v185_v62 = vld [vmem:[#allocation2 + $0x400] sm:$0xff]  ;;  %v187_v63 = vld [vmem:[#allocation2 + $0x410] sm:$0xff]  ;;  %v310_v0 = vld [vmem:[#allocation2 + $0x7e8] sm:$0xff] }
  0x31   :  { %334 = vmatpush1.msra.mxu0 %v205_v42  ;;  %441 = vmatpush1.msra.mxu1 %v207_v43  ;;  %v312_v1 = vld [vmem:[#allocation2 + $0x7f8] sm:$0xff]  ;;  %v309_v2 = vld [vmem:[#allocation2 + $0x7e0] sm:$0xff]  ;;  %v311_v3 = vld [vmem:[#allocation2 + $0x7f0] sm:$0xff] }
  0x32   :  { %335 = vmatprep.subr.mxu0 %v202_v44  ;;  %442 = vmatprep.subr.mxu1 %v204_v45  ;;  %v306_v4 = vld [vmem:[#allocation2 + $0x7c8] sm:$0xff]  ;;  %v308_v5 = vld [vmem:[#allocation2 + $0x7d8] sm:$0xff]  ;;  %v305_v6 = vld [vmem:[#allocation2 + $0x7c0] sm:$0xff] }
  0x33   :  { %336 = vmatpush1.msra.mxu0 %v201_v46  ;;  %443 = vmatpush1.msra.mxu1 %v203_v47  ;;  %v307_v7 = vld [vmem:[#allocation2 + $0x7d0] sm:$0xff]  ;;  %v302_v8 = vld [vmem:[#allocation2 + $0x7a8] sm:$0xff]  ;;  %v304_v9 = vld [vmem:[#allocation2 + $0x7b8] sm:$0xff] }
  0x34   :  { %337 = vmatprep.subr.mxu0 %v198_v48  ;;  %444 = vmatprep.subr.mxu1 %v200_v49  ;;  %v301_v10 = vld [vmem:[#allocation2 + $0x7a0] sm:$0xff]  ;;  %v303_v11 = vld [vmem:[#allocation2 + $0x7b0] sm:$0xff]  ;;  %v298_v12 = vld [vmem:[#allocation2 + $0x788] sm:$0xff] }
  0x35   :  { %338 = vmatpush1.msra.mxu0 %v197_v50  ;;  %445 = vmatpush1.msra.mxu1 %v199_v51  ;;  %v300_v13 = vld [vmem:[#allocation2 + $0x798] sm:$0xff]  ;;  %v297_v14 = vld [vmem:[#allocation2 + $0x780] sm:$0xff]  ;;  %v299_v15 = vld [vmem:[#allocation2 + $0x790] sm:$0xff] }
  0x36   :  { %339 = vmatprep.subr.mxu0 %v194_v52  ;;  %446 = vmatprep.subr.mxu1 %v196_v53  ;;  %v294_v16 = vld [vmem:[#allocation2 + $0x768] sm:$0xff]  ;;  %v296_v17 = vld [vmem:[#allocation2 + $0x778] sm:$0xff]  ;;  %v293_v18 = vld [vmem:[#allocation2 + $0x760] sm:$0xff] }
  0x37   :  { %340 = vmatpush1.msra.mxu0 %v193_v54  ;;  %447 = vmatpush1.msra.mxu1 %v195_v55  ;;  %v295_v19 = vld [vmem:[#allocation2 + $0x770] sm:$0xff]  ;;  %v290_v20 = vld [vmem:[#allocation2 + $0x748] sm:$0xff]  ;;  %v292_v21 = vld [vmem:[#allocation2 + $0x758] sm:$0xff] }
  0x38   :  { %341 = vmatprep.subr.mxu0 %v190_v56  ;;  %448 = vmatprep.subr.mxu1 %v192_v57  ;;  %v289_v22 = vld [vmem:[#allocation2 + $0x740] sm:$0xff]  ;;  %v291_v23 = vld [vmem:[#allocation2 + $0x750] sm:$0xff]  ;;  %v286_v24 = vld [vmem:[#allocation2 + $0x728] sm:$0xff] }
  0x39   :  { %342 = vmatpush1.msra.mxu0 %v189_v58  ;;  %449 = vmatpush1.msra.mxu1 %v191_v59  ;;  %v288_v25 = vld [vmem:[#allocation2 + $0x738] sm:$0xff]  ;;  %v285_v26 = vld [vmem:[#allocation2 + $0x720] sm:$0xff]  ;;  %v287_v27 = vld [vmem:[#allocation2 + $0x730] sm:$0xff] }
  0x3a   :  { %343 = vmatprep.subr.mxu0 %v186_v60  ;;  %450 = vmatprep.subr.mxu1 %v188_v61  ;;  %v282_v28 = vld [vmem:[#allocation2 + $0x708] sm:$0xff]  ;;  %v284_v29 = vld [vmem:[#allocation2 + $0x718] sm:$0xff]  ;;  %v281_v30 = vld [vmem:[#allocation2 + $0x700] sm:$0xff] }
  0x3b   :  { %344 = vmatpush1.msra.mxu0 %v185_v62  ;;  %451 = vmatpush1.msra.mxu1 %v187_v63  ;;  %v283_v31 = vld [vmem:[#allocation2 + $0x710] sm:$0xff]  ;;  %v278_v32 = vld [vmem:[#allocation2 + $0x6e8] sm:$0xff]  ;;  %v280_v33 = vld [vmem:[#allocation2 + $0x6f8] sm:$0xff] }
  0x3c   :  { %345 = vmatprep.subr.mxu0 %v310_v0  ;;  %452 = vmatprep.subr.mxu1 %v312_v1  ;;  %v277_v34 = vld [vmem:[#allocation2 + $0x6e0] sm:$0xff]  ;;  %v279_v35 = vld [vmem:[#allocation2 + $0x6f0] sm:$0xff]  ;;  %v274_v36 = vld [vmem:[#allocation2 + $0x6c8] sm:$0xff] }
  0x3d   :  { %346 = vmatpush2.msra.mxu0 %v309_v2  ;;  %453 = vmatpush2.msra.mxu1 %v311_v3  ;;  %v276_v37 = vld [vmem:[#allocation2 + $0x6d8] sm:$0xff]  ;;  %v273_v38 = vld [vmem:[#allocation2 + $0x6c0] sm:$0xff]  ;;  %v275_v39 = vld [vmem:[#allocation2 + $0x6d0] sm:$0xff] }
  0x3e   :  { %347 = vmatprep.subr.mxu0 %v306_v4  ;;  %454 = vmatprep.subr.mxu1 %v308_v5  ;;  %v270_v40 = vld [vmem:[#allocation2 + $0x6a8] sm:$0xff]  ;;  %v272_v41 = vld [vmem:[#allocation2 + $0x6b8] sm:$0xff]  ;;  %v269_v42 = vld [vmem:[#allocation2 + $0x6a0] sm:$0xff] }
  0x3f   :  { %348 = vmatpush2.msra.mxu0 %v305_v6  ;;  %455 = vmatpush2.msra.mxu1 %v307_v7  ;;  %v271_v43 = vld [vmem:[#allocation2 + $0x6b0] sm:$0xff]  ;;  %v266_v44 = vld [vmem:[#allocation2 + $0x688] sm:$0xff]  ;;  %v268_v45 = vld [vmem:[#allocation2 + $0x698] sm:$0xff] }
  0x40   :  { %349 = vmatprep.subr.mxu0 %v302_v8  ;;  %456 = vmatprep.subr.mxu1 %v304_v9  ;;  %v265_v46 = vld [vmem:[#allocation2 + $0x680] sm:$0xff]  ;;  %v267_v47 = vld [vmem:[#allocation2 + $0x690] sm:$0xff]  ;;  %v262_v48 = vld [vmem:[#allocation2 + $0x668] sm:$0xff] }
  0x41   :  { %350 = vmatpush2.msra.mxu0 %v301_v10  ;;  %457 = vmatpush2.msra.mxu1 %v303_v11  ;;  %v264_v49 = vld [vmem:[#allocation2 + $0x678] sm:$0xff]  ;;  %v261_v50 = vld [vmem:[#allocation2 + $0x660] sm:$0xff]  ;;  %v263_v51 = vld [vmem:[#allocation2 + $0x670] sm:$0xff] }
  0x42   :  { %351 = vmatprep.subr.mxu0 %v298_v12  ;;  %458 = vmatprep.subr.mxu1 %v300_v13  ;;  %v258_v52 = vld [vmem:[#allocation2 + $0x648] sm:$0xff]  ;;  %v260_v53 = vld [vmem:[#allocation2 + $0x658] sm:$0xff]  ;;  %v257_v54 = vld [vmem:[#allocation2 + $0x640] sm:$0xff] }
  0x43   :  { %352 = vmatpush2.msra.mxu0 %v297_v14  ;;  %459 = vmatpush2.msra.mxu1 %v299_v15  ;;  %v259_v55 = vld [vmem:[#allocation2 + $0x650] sm:$0xff]  ;;  %v254_v56 = vld [vmem:[#allocation2 + $0x628] sm:$0xff]  ;;  %v256_v57 = vld [vmem:[#allocation2 + $0x638] sm:$0xff] }
  0x44   :  { %353 = vmatprep.subr.mxu0 %v294_v16  ;;  %460 = vmatprep.subr.mxu1 %v296_v17  ;;  %v253_v58 = vld [vmem:[#allocation2 + $0x620] sm:$0xff]  ;;  %v255_v59 = vld [vmem:[#allocation2 + $0x630] sm:$0xff]  ;;  %v250_v60 = vld [vmem:[#allocation2 + $0x608] sm:$0xff] }
  0x45   :  { %354 = vmatpush2.msra.mxu0 %v293_v18  ;;  %461 = vmatpush2.msra.mxu1 %v295_v19  ;;  %v252_v61 = vld [vmem:[#allocation2 + $0x618] sm:$0xff]  ;;  %v249_v62 = vld [vmem:[#allocation2 + $0x600] sm:$0xff]  ;;  %v251_v0 = vld [vmem:[#allocation2 + $0x610] sm:$0xff] }
  0x46   :  { %355 = vmatprep.subr.mxu0 %v290_v20  ;;  %462 = vmatprep.subr.mxu1 %v292_v21  ;;  %v1370_v63 = vld [vmem:[%s1831_s0 + $0x18] sm:$0xff]  ;;  %v1375_v1 = vld [vmem:[%s1831_s0 + $0x10] sm:$0xff]  ;;  %v115_v2 = vld [vmem:[#allocation2 + $0x1e8] sm:$0xff] }
  0x47   :  { %356 = vmatpush2.msra.mxu0 %v289_v22  ;;  %463 = vmatpush2.msra.mxu1 %v291_v23  ;;  %v117_v3 = vld [vmem:[#allocation2 + $0x1f8] sm:$0xff]  ;;  %v114_v4 = vld [vmem:[#allocation2 + $0x1e0] sm:$0xff]  ;;  %v116_v5 = vld [vmem:[#allocation2 + $0x1f0] sm:$0xff] }
  0x48   :  { %357 = vmatprep.subr.mxu0 %v286_v24  ;;  %464 = vmatprep.subr.mxu1 %v288_v25  ;;  %v111_v6 = vld [vmem:[#allocation2 + $0x1c8] sm:$0xff]  ;;  %v113_v7 = vld [vmem:[#allocation2 + $0x1d8] sm:$0xff]  ;;  %v110_v8 = vld [vmem:[#allocation2 + $0x1c0] sm:$0xff] }
  0x49   :  { %358 = vmatpush2.msra.mxu0 %v285_v26  ;;  %465 = vmatpush2.msra.mxu1 %v287_v27  ;;  %v112_v9 = vld [vmem:[#allocation2 + $0x1d0] sm:$0xff]  ;;  %v107_v10 = vld [vmem:[#allocation2 + $0x1a8] sm:$0xff]  ;;  %v109_v11 = vld [vmem:[#allocation2 + $0x1b8] sm:$0xff] }
  0x4a   :  { %359 = vmatprep.subr.mxu0 %v282_v28  ;;  %466 = vmatprep.subr.mxu1 %v284_v29  ;;  %v106_v12 = vld [vmem:[#allocation2 + $0x1a0] sm:$0xff]  ;;  %v108_v13 = vld [vmem:[#allocation2 + $0x1b0] sm:$0xff]  ;;  %v103_v14 = vld [vmem:[#allocation2 + $0x188] sm:$0xff] }
  0x4b   :  { %360 = vmatpush2.msra.mxu0 %v281_v30  ;;  %467 = vmatpush2.msra.mxu1 %v283_v31  ;;  %v105_v15 = vld [vmem:[#allocation2 + $0x198] sm:$0xff]  ;;  %v102_v16 = vld [vmem:[#allocation2 + $0x180] sm:$0xff]  ;;  %v104_v17 = vld [vmem:[#allocation2 + $0x190] sm:$0xff] }
  0x4c   :  { %361 = vmatprep.subr.mxu0 %v278_v32  ;;  %468 = vmatprep.subr.mxu1 %v280_v33  ;;  %v99_v18 = vld [vmem:[#allocation2 + $0x168] sm:$0xff]  ;;  %v101_v19 = vld [vmem:[#allocation2 + $0x178] sm:$0xff]  ;;  %v98_v20 = vld [vmem:[#allocation2 + $0x160] sm:$0xff] }
  0x4d   :  { %362 = vmatpush2.msra.mxu0 %v277_v34  ;;  %469 = vmatpush2.msra.mxu1 %v279_v35  ;;  %v100_v21 = vld [vmem:[#allocation2 + $0x170] sm:$0xff]  ;;  %v95_v22 = vld [vmem:[#allocation2 + $0x148] sm:$0xff]  ;;  %v97_v23 = vld [vmem:[#allocation2 + $0x158] sm:$0xff] }
  0x4e   :  { %363 = vmatprep.subr.mxu0 %v274_v36  ;;  %470 = vmatprep.subr.mxu1 %v276_v37  ;;  %v94_v24 = vld [vmem:[#allocation2 + $0x140] sm:$0xff]  ;;  %v96_v25 = vld [vmem:[#allocation2 + $0x150] sm:$0xff]  ;;  %v91_v26 = vld [vmem:[#allocation2 + $0x128] sm:$0xff] }
  0x4f   :  { %364 = vmatpush2.msra.mxu0 %v273_v38  ;;  %471 = vmatpush2.msra.mxu1 %v275_v39  ;;  %v93_v27 = vld [vmem:[#allocation2 + $0x138] sm:$0xff]  ;;  %v90_v28 = vld [vmem:[#allocation2 + $0x120] sm:$0xff]  ;;  %v92_v29 = vld [vmem:[#allocation2 + $0x130] sm:$0xff] }
  0x50   :  { %365 = vmatprep.subr.mxu0 %v270_v40  ;;  %472 = vmatprep.subr.mxu1 %v272_v41  ;;  %v87_v30 = vld [vmem:[#allocation2 + $0x108] sm:$0xff]  ;;  %v89_v31 = vld [vmem:[#allocation2 + $0x118] sm:$0xff]  ;;  %v86_v32 = vld [vmem:[#allocation2 + $0x100] sm:$0xff] }
  0x51   :  { %366 = vmatpush2.msra.mxu0 %v269_v42  ;;  %473 = vmatpush2.msra.mxu1 %v271_v43  ;;  %v88_v33 = vld [vmem:[#allocation2 + $0x110] sm:$0xff]  ;;  %v83_v34 = vld [vmem:[#allocation2 + $0xe8] sm:$0xff]  ;;  %v85_v35 = vld [vmem:[#allocation2 + $0xf8] sm:$0xff] }
  0x52   :  { %367 = vmatprep.subr.mxu0 %v266_v44  ;;  %474 = vmatprep.subr.mxu1 %v268_v45  ;;  %v82_v36 = vld [vmem:[#allocation2 + $0xe0] sm:$0xff]  ;;  %v84_v37 = vld [vmem:[#allocation2 + $0xf0] sm:$0xff]  ;;  %v79_v38 = vld [vmem:[#allocation2 + $0xc8] sm:$0xff] }
  0x53   :  { %368 = vmatpush2.msra.mxu0 %v265_v46  ;;  %475 = vmatpush2.msra.mxu1 %v267_v47  ;;  %v81_v39 = vld [vmem:[#allocation2 + $0xd8] sm:$0xff]  ;;  %v78_v40 = vld [vmem:[#allocation2 + $0xc0] sm:$0xff]  ;;  %v80_v41 = vld [vmem:[#allocation2 + $0xd0] sm:$0xff] }
  0x54   :  { %369 = vmatprep.subr.mxu0 %v262_v48  ;;  %476 = vmatprep.subr.mxu1 %v264_v49  ;;  %v75_v42 = vld [vmem:[#allocation2 + $0xa8] sm:$0xff]  ;;  %v77_v43 = vld [vmem:[#allocation2 + $0xb8] sm:$0xff]  ;;  %v74_v44 = vld [vmem:[#allocation2 + $0xa0] sm:$0xff] }
  0x55   :  { %370 = vmatpush2.msra.mxu0 %v261_v50  ;;  %477 = vmatpush2.msra.mxu1 %v263_v51  ;;  %v76_v45 = vld [vmem:[#allocation2 + $0xb0] sm:$0xff]  ;;  %v71_v46 = vld [vmem:[#allocation2 + $0x88] sm:$0xff]  ;;  %v73_v47 = vld [vmem:[#allocation2 + $0x98] sm:$0xff] }
  0x56   :  { %371 = vmatprep.subr.mxu0 %v258_v52  ;;  %478 = vmatprep.subr.mxu1 %v260_v53  ;;  %v70_v48 = vld [vmem:[#allocation2 + $0x80] sm:$0xff]  ;;  %v72_v49 = vld [vmem:[#allocation2 + $0x90] sm:$0xff]  ;;  %v67_v50 = vld [vmem:[#allocation2 + $0x68] sm:$0xff] }
  0x57   :  { %372 = vmatpush2.msra.mxu0 %v257_v54  ;;  %479 = vmatpush2.msra.mxu1 %v259_v55  ;;  %v69_v51 = vld [vmem:[#allocation2 + $0x78] sm:$0xff]  ;;  %v66_v52 = vld [vmem:[#allocation2 + $0x60] sm:$0xff]  ;;  %v68_v53 = vld [vmem:[#allocation2 + $0x70] sm:$0xff] }
  0x58   :  { %373 = vmatprep.subr.mxu0 %v254_v56  ;;  %480 = vmatprep.subr.mxu1 %v256_v57  ;;  %v63_v54 = vld [vmem:[#allocation2 + $0x48] sm:$0xff]  ;;  %v65_v55 = vld [vmem:[#allocation2 + $0x58] sm:$0xff]  ;;  %v62_v56 = vld [vmem:[#allocation2 + $0x40] sm:$0xff] }
  0x59   :  { %374 = vmatpush2.msra.mxu0 %v253_v58  ;;  %481 = vmatpush2.msra.mxu1 %v255_v59  ;;  %v64_v57 = vld [vmem:[#allocation2 + $0x50] sm:$0xff]  ;;  %v59_v58 = vld [vmem:[#allocation2 + $0x28] sm:$0xff]  ;;  %v61_v59 = vld [vmem:[#allocation2 + $0x38] sm:$0xff] }
  0x5a   :  { %375 = vmatprep.subr.mxu0 %v250_v60  ;;  %482 = vmatprep.subr.mxu1 %v252_v61  ;;  %v58_v60 = vld [vmem:[#allocation2 + $0x20] sm:$0xff]  ;;  %v60_v61 = vld [vmem:[#allocation2 + $0x30] sm:$0xff] }
  0x5b   :  { %376 = vmatpush2.msra.mxu0 %v249_v62  ;;  %377 = vmatprep.mubr.f32.mxu0 %v1370_v63  ;;  %v55_v62 = vld [vmem:[#allocation2 + $0x8] sm:$0xff] }
  0x5c   :  { %483 = vmatpush2.msra.mxu1 %v251_v0  ;;  %484 = vmatprep.mubr.f32.mxu1 %v1370_v63  ;;  %v57_v0 = vld [vmem:[#allocation2 + $0x18] sm:$0xff] }
  0x5d   :  { %378 = vmatmul.mubr.f32.vlgmr.msra.gmra.mxu0 %v1375_v1  ;;  %485 = vmatmul.mubr.f32.vlgmr.msra.gmra.mxu1 %v1375_v1 }
  0x5e   :  { %527 = vmatprep.subr.mxu0 %v115_v2  ;;  %634 = vmatprep.subr.mxu1 %v117_v3  ;;  %v54_v2 = vld [vmem:[#allocation2] sm:$0xff]  ;;  %v56_v3 = vld [vmem:[#allocation2 + $0x10] sm:$0xff] }
  0x5f   :  { %528 = vmatpush1.msra.mxu0 %v114_v4  ;;  %635 = vmatpush1.msra.mxu1 %v116_v5  ;;  %v179_v4 = vld [vmem:[#allocation2 + $0x3e8] sm:$0xff]  ;;  %v181_v5 = vld [vmem:[#allocation2 + $0x3f8] sm:$0xff] }
  0x60   :  { %529 = vmatprep.subr.mxu0 %v111_v6  ;;  %636 = vmatprep.subr.mxu1 %v113_v7  ;;  %v178_v6 = vld [vmem:[#allocation2 + $0x3e0] sm:$0xff]  ;;  %v180_v7 = vld [vmem:[#allocation2 + $0x3f0] sm:$0xff] }
  0x61   :  { %530 = vmatpush1.msra.mxu0 %v110_v8  ;;  %637 = vmatpush1.msra.mxu1 %v112_v9  ;;  %v175_v8 = vld [vmem:[#allocation2 + $0x3c8] sm:$0xff]  ;;  %v177_v9 = vld [vmem:[#allocation2 + $0x3d8] sm:$0xff] }
  0x62   :  { %531 = vmatprep.subr.mxu0 %v107_v10  ;;  %638 = vmatprep.subr.mxu1 %v109_v11  ;;  %v174_v10 = vld [vmem:[#allocation2 + $0x3c0] sm:$0xff]  ;;  %v176_v11 = vld [vmem:[#allocation2 + $0x3d0] sm:$0xff] }
  0x63   :  { %532 = vmatpush1.msra.mxu0 %v106_v12  ;;  %639 = vmatpush1.msra.mxu1 %v108_v13  ;;  %v171_v12 = vld [vmem:[#allocation2 + $0x3a8] sm:$0xff]  ;;  %v173_v13 = vld [vmem:[#allocation2 + $0x3b8] sm:$0xff] }
  0x64   :  { %533 = vmatprep.subr.mxu0 %v103_v14  ;;  %640 = vmatprep.subr.mxu1 %v105_v15  ;;  %v170_v14 = vld [vmem:[#allocation2 + $0x3a0] sm:$0xff]  ;;  %v172_v15 = vld [vmem:[#allocation2 + $0x3b0] sm:$0xff] }
  0x65   :  { %534 = vmatpush1.msra.mxu0 %v102_v16  ;;  %641 = vmatpush1.msra.mxu1 %v104_v17  ;;  %v1384_v16 = vld [vmem:[%s1831_s0 + $0x28] sm:$0xff] }
  0x66   :  { %535 = vmatprep.subr.mxu0 %v99_v18  ;;  %642 = vmatprep.subr.mxu1 %v101_v19  ;;  %v167_v17 = vld [vmem:[#allocation2 + $0x388] sm:$0xff]  ;;  %v169_v18 = vld [vmem:[#allocation2 + $0x398] sm:$0xff]  ;;  %v1389_v19 = vld [vmem:[%s1831_s0 + $0x20] sm:$0xff] }
  0x67   :  { %536 = vmatpush1.msra.mxu0 %v98_v20  ;;  %643 = vmatpush1.msra.mxu1 %v100_v21  ;;  %v166_v20 = vld [vmem:[#allocation2 + $0x380] sm:$0xff]  ;;  %v168_v21 = vld [vmem:[#allocation2 + $0x390] sm:$0xff] }
  0x68   :  { %537 = vmatprep.subr.mxu0 %v95_v22  ;;  %644 = vmatprep.subr.mxu1 %v97_v23  ;;  %v163_v22 = vld [vmem:[#allocation2 + $0x368] sm:$0xff]  ;;  %v165_v23 = vld [vmem:[#allocation2 + $0x378] sm:$0xff] }
  0x69   :  { %538 = vmatpush1.msra.mxu0 %v94_v24  ;;  %645 = vmatpush1.msra.mxu1 %v96_v25  ;;  %v162_v24 = vld [vmem:[#allocation2 + $0x360] sm:$0xff]  ;;  %v164_v25 = vld [vmem:[#allocation2 + $0x370] sm:$0xff] }
  0x6a   :  { %539 = vmatprep.subr.mxu0 %v91_v26  ;;  %646 = vmatprep.subr.mxu1 %v93_v27  ;;  %v1398_v26 = vld [vmem:[%s1831_s0 + $0x38] sm:$0xff]  ;;  %v159_v27 = vld [vmem:[#allocation2 + $0x348] sm:$0xff] }
  0x6b   :  { %540 = vmatpush1.msra.mxu0 %v90_v28  ;;  %647 = vmatpush1.msra.mxu1 %v92_v29  ;;  %v161_v28 = vld [vmem:[#allocation2 + $0x358] sm:$0xff]  ;;  %v1403_v29 = vld [vmem:[%s1831_s0 + $0x30] sm:$0xff] }
  0x6c   :  { %541 = vmatprep.subr.mxu0 %v87_v30  ;;  %648 = vmatprep.subr.mxu1 %v89_v31  ;;  %v158_v30 = vld [vmem:[#allocation2 + $0x340] sm:$0xff]  ;;  %v160_v31 = vld [vmem:[#allocation2 + $0x350] sm:$0xff] }
  0x6d   :  { %542 = vmatpush1.msra.mxu0 %v86_v32  ;;  %649 = vmatpush1.msra.mxu1 %v88_v33  ;;  %v155_v32 = vld [vmem:[#allocation2 + $0x328] sm:$0xff]  ;;  %v157_v33 = vld [vmem:[#allocation2 + $0x338] sm:$0xff] }
  0x6e   :  { %543 = vmatprep.subr.mxu0 %v83_v34  ;;  %650 = vmatprep.subr.mxu1 %v85_v35  ;;  %v154_v34 = vld [vmem:[#allocation2 + $0x320] sm:$0xff]  ;;  %v156_v35 = vld [vmem:[#allocation2 + $0x330] sm:$0xff] }
  0x6f   :  { %544 = vmatpush1.msra.mxu0 %v82_v36  ;;  %651 = vmatpush1.msra.mxu1 %v84_v37  ;;  %v1412_v36 = vld [vmem:[%s1831_s0 + $0x48] sm:$0xff] }
  0x70   :  { %545 = vmatprep.subr.mxu0 %v79_v38  ;;  %652 = vmatprep.subr.mxu1 %v81_v39  ;;  %v151_v37 = vld [vmem:[#allocation2 + $0x308] sm:$0xff]  ;;  %v153_v38 = vld [vmem:[#allocation2 + $0x318] sm:$0xff]  ;;  %v1417_v39 = vld [vmem:[%s1831_s0 + $0x40] sm:$0xff] }
  0x71   :  { %546 = vmatpush1.msra.mxu0 %v78_v40  ;;  %653 = vmatpush1.msra.mxu1 %v80_v41  ;;  %v150_v40 = vld [vmem:[#allocation2 + $0x300] sm:$0xff]  ;;  %v152_v41 = vld [vmem:[#allocation2 + $0x310] sm:$0xff] }
  0x72   :  { %547 = vmatprep.subr.mxu0 %v75_v42  ;;  %654 = vmatprep.subr.mxu1 %v77_v43  ;;  %v147_v42 = vld [vmem:[#allocation2 + $0x2e8] sm:$0xff]  ;;  %v149_v43 = vld [vmem:[#allocation2 + $0x2f8] sm:$0xff] }
  0x73   :  { %548 = vmatpush1.msra.mxu0 %v74_v44  ;;  %655 = vmatpush1.msra.mxu1 %v76_v45  ;;  %v146_v44 = vld [vmem:[#allocation2 + $0x2e0] sm:$0xff]  ;;  %v148_v45 = vld [vmem:[#allocation2 + $0x2f0] sm:$0xff] }
  0x74   :  { %549 = vmatprep.subr.mxu0 %v71_v46  ;;  %656 = vmatprep.subr.mxu1 %v73_v47  ;;  %v1426_v46 = vld [vmem:[%s1831_s0 + $0x58] sm:$0xff]  ;;  %v143_v47 = vld [vmem:[#allocation2 + $0x2c8] sm:$0xff] }
  0x75   :  { %550 = vmatpush1.msra.mxu0 %v70_v48  ;;  %657 = vmatpush1.msra.mxu1 %v72_v49  ;;  %v145_v48 = vld [vmem:[#allocation2 + $0x2d8] sm:$0xff]  ;;  %v1431_v49 = vld [vmem:[%s1831_s0 + $0x50] sm:$0xff] }
  0x76   :  { %551 = vmatprep.subr.mxu0 %v67_v50  ;;  %658 = vmatprep.subr.mxu1 %v69_v51  ;;  %v142_v50 = vld [vmem:[#allocation2 + $0x2c0] sm:$0xff]  ;;  %v144_v51 = vld [vmem:[#allocation2 + $0x2d0] sm:$0xff] }
  0x77   :  { %552 = vmatpush1.msra.mxu0 %v66_v52  ;;  %659 = vmatpush1.msra.mxu1 %v68_v53  ;;  %v139_v52 = vld [vmem:[#allocation2 + $0x2a8] sm:$0xff]  ;;  %v141_v53 = vld [vmem:[#allocation2 + $0x2b8] sm:$0xff] }
  0x78   :  { %553 = vmatprep.subr.mxu0 %v63_v54  ;;  %660 = vmatprep.subr.mxu1 %v65_v55  ;;  %v138_v54 = vld [vmem:[#allocation2 + $0x2a0] sm:$0xff]  ;;  %v140_v55 = vld [vmem:[#allocation2 + $0x2b0] sm:$0xff] }
  0x79   :  { %554 = vmatpush1.msra.mxu0 %v62_v56  ;;  %661 = vmatpush1.msra.mxu1 %v64_v57  ;;  %v1440_v56 = vld [vmem:[%s1831_s0 + $0x68] sm:$0xff] }
  0x7a   :  { %555 = vmatprep.subr.mxu0 %v59_v58  ;;  %662 = vmatprep.subr.mxu1 %v61_v59  ;;  %v135_v57 = vld [vmem:[#allocation2 + $0x288] sm:$0xff]  ;;  %v137_v58 = vld [vmem:[#allocation2 + $0x298] sm:$0xff]  ;;  %v1445_v59 = vld [vmem:[%s1831_s0 + $0x60] sm:$0xff] }
  0x7b   :  { %556 = vmatpush1.msra.mxu0 %v58_v60  ;;  %663 = vmatpush1.msra.mxu1 %v60_v61  ;;  %v134_v60 = vld [vmem:[#allocation2 + $0x280] sm:$0xff]  ;;  %v136_v61 = vld [vmem:[#allocation2 + $0x290] sm:$0xff] }
  0x7c   :  { %557 = vmatprep.subr.mxu0 %v55_v62  ;;  %664 = vmatprep.subr.mxu1 %v57_v0  ;;  %v131_v62 = vld [vmem:[#allocation2 + $0x268] sm:$0xff]  ;;  %v133_v0 = vld [vmem:[#allocation2 + $0x278] sm:$0xff] }
  0x7d   :  { %558 = vmatpush1.msra.mxu0 %v54_v2  ;;  %665 = vmatpush1.msra.mxu1 %v56_v3  ;;  %v130_v2 = vld [vmem:[#allocation2 + $0x260] sm:$0xff]  ;;  %v132_v3 = vld [vmem:[#allocation2 + $0x270] sm:$0xff] }
  0x7e   :  { %559 = vmatprep.subr.mxu0 %v179_v4  ;;  %666 = vmatprep.subr.mxu1 %v181_v5  ;;  %v1454_v4 = vld [vmem:[%s1831_s0 + $0x78] sm:$0xff]  ;;  %v127_v5 = vld [vmem:[#allocation2 + $0x248] sm:$0xff] }
  0x7f   :  { %560 = vmatpush2.msra.mxu0 %v178_v6  ;;  %667 = vmatpush2.msra.mxu1 %v180_v7  ;;  %v129_v6 = vld [vmem:[#allocation2 + $0x258] sm:$0xff]  ;;  %v1459_v7 = vld [vmem:[%s1831_s0 + $0x70] sm:$0xff] }
  0x80   :  { %561 = vmatprep.subr.mxu0 %v175_v8  ;;  %668 = vmatprep.subr.mxu1 %v177_v9  ;;  %v126_v8 = vld [vmem:[#allocation2 + $0x240] sm:$0xff]  ;;  %v128_v9 = vld [vmem:[#allocation2 + $0x250] sm:$0xff] }
  0x81   :  { %562 = vmatpush2.msra.mxu0 %v174_v10  ;;  %669 = vmatpush2.msra.mxu1 %v176_v11  ;;  %v123_v10 = vld [vmem:[#allocation2 + $0x228] sm:$0xff]  ;;  %v125_v11 = vld [vmem:[#allocation2 + $0x238] sm:$0xff] }
  0x82   :  { %563 = vmatprep.subr.mxu0 %v171_v12  ;;  %670 = vmatprep.subr.mxu1 %v173_v13  ;;  %v122_v12 = vld [vmem:[#allocation2 + $0x220] sm:$0xff]  ;;  %v124_v13 = vld [vmem:[#allocation2 + $0x230] sm:$0xff] }
  0x83   :  { %564 = vmatpush2.msra.mxu0 %v170_v14  ;;  %671 = vmatpush2.msra.mxu1 %v172_v15  ;;  %v119_v14 = vld [vmem:[#allocation2 + $0x208] sm:$0xff]  ;;  %v121_v15 = vld [vmem:[#allocation2 + $0x218] sm:$0xff] }
  0x84   :  { %383 = vmatprep.mubr.f32.mxu0 %v1384_v16  ;;  %490 = vmatprep.mubr.f32.mxu1 %v1384_v16 }
  0x85   :  { %565 = vmatprep.subr.mxu0 %v167_v17  ;;  %672 = vmatprep.subr.mxu1 %v169_v18  ;;  %v118_v17 = vld [vmem:[#allocation2 + $0x200] sm:$0xff]  ;;  %v41_v18 = vld [vmem:[%s1831_s0 + $0x8] sm:$0xff] }
  0x86   :  { %384 = vmatmul.mubr.f32.gmra.mxu0 %v1389_v19  ;;  %491 = vmatmul.mubr.f32.gmra.mxu1 %v1389_v19 }
  0x87   :  { %566 = vmatpush2.msra.mxu0 %v166_v20  ;;  %673 = vmatpush2.msra.mxu1 %v168_v21  ;;  %v120_v20 = vld [vmem:[#allocation2 + $0x210] sm:$0xff]  ;;  %v40_v21 = vld [vmem:[%s1831_s0] sm:$0xff] }
  0x88   :  { %567 = vmatprep.subr.mxu0 %v163_v22  ;;  %674 = vmatprep.subr.mxu1 %v165_v23  ;;  %v817_v22 = vld [vmem:[#allocation2 + $0x9e8] sm:$0xff]  ;;  %v819_v23 = vld [vmem:[#allocation2 + $0x9f8] sm:$0xff] }
  0x89   :  { %568 = vmatpush2.msra.mxu0 %v162_v24  ;;  %675 = vmatpush2.msra.mxu1 %v164_v25  ;;  %v816_v24 = vld [vmem:[#allocation2 + $0x9e0] sm:$0xff]  ;;  %v818_v25 = vld [vmem:[#allocation2 + $0x9f0] sm:$0xff] }
  0x8a   :  { %389 = vmatprep.mubr.f32.mxu0 %v1398_v26  ;;  %496 = vmatprep.mubr.f32.mxu1 %v1398_v26 }
  0x8b   :  { %569 = vmatprep.subr.mxu0 %v159_v27  ;;  %676 = vmatprep.subr.mxu1 %v161_v28  ;;  %v813_v27 = vld [vmem:[#allocation2 + $0x9c8] sm:$0xff]  ;;  %v815_v28 = vld [vmem:[#allocation2 + $0x9d8] sm:$0xff] }
  0x8c   :  { %390 = vmatmul.mubr.f32.gmra.mxu0 %v1403_v29  ;;  %497 = vmatmul.mubr.f32.gmra.mxu1 %v1403_v29 }
  0x8d   :  { %570 = vmatpush2.msra.mxu0 %v158_v30  ;;  %677 = vmatpush2.msra.mxu1 %v160_v31  ;;  %v812_v30 = vld [vmem:[#allocation2 + $0x9c0] sm:$0xff]  ;;  %v814_v31 = vld [vmem:[#allocation2 + $0x9d0] sm:$0xff] }
  0x8e   :  { %571 = vmatprep.subr.mxu0 %v155_v32  ;;  %678 = vmatprep.subr.mxu1 %v157_v33  ;;  %v809_v32 = vld [vmem:[#allocation2 + $0x9a8] sm:$0xff]  ;;  %v811_v33 = vld [vmem:[#allocation2 + $0x9b8] sm:$0xff] }
  0x8f   :  { %572 = vmatpush2.msra.mxu0 %v154_v34  ;;  %679 = vmatpush2.msra.mxu1 %v156_v35  ;;  %v808_v34 = vld [vmem:[#allocation2 + $0x9a0] sm:$0xff]  ;;  %v810_v35 = vld [vmem:[#allocation2 + $0x9b0] sm:$0xff] }
  0x90   :  { %395 = vmatprep.mubr.f32.mxu0 %v1412_v36  ;;  %502 = vmatprep.mubr.f32.mxu1 %v1412_v36 }
  0x91   :  { %573 = vmatprep.subr.mxu0 %v151_v37  ;;  %680 = vmatprep.subr.mxu1 %v153_v38  ;;  %v805_v37 = vld [vmem:[#allocation2 + $0x988] sm:$0xff]  ;;  %v807_v38 = vld [vmem:[#allocation2 + $0x998] sm:$0xff] }
  0x92   :  { %396 = vmatmul.mubr.f32.gmra.mxu0 %v1417_v39  ;;  %503 = vmatmul.mubr.f32.gmra.mxu1 %v1417_v39 }
  0x93   :  { %574 = vmatpush2.msra.mxu0 %v150_v40  ;;  %681 = vmatpush2.msra.mxu1 %v152_v41  ;;  %v804_v40 = vld [vmem:[#allocation2 + $0x980] sm:$0xff]  ;;  %v806_v41 = vld [vmem:[#allocation2 + $0x990] sm:$0xff] }
  0x94   :  { %575 = vmatprep.subr.mxu0 %v147_v42  ;;  %682 = vmatprep.subr.mxu1 %v149_v43  ;;  %v803_v42 = vld [vmem:[#allocation2 + $0x978] sm:$0xff]  ;;  %v800_v43 = vld [vmem:[#allocation2 + $0x960] sm:$0xff] }
  0x95   :  { %576 = vmatpush2.msra.mxu0 %v146_v44  ;;  %683 = vmatpush2.msra.mxu1 %v148_v45  ;;  %v797_v44 = vld [vmem:[#allocation2 + $0x948] sm:$0xff]  ;;  %v799_v45 = vld [vmem:[#allocation2 + $0x958] sm:$0xff] }
  0x96   :  { %401 = vmatprep.mubr.f32.mxu0 %v1426_v46  ;;  %508 = vmatprep.mubr.f32.mxu1 %v1426_v46 }
  0x97   :  { %577 = vmatprep.subr.mxu0 %v143_v47  ;;  %684 = vmatprep.subr.mxu1 %v145_v48  ;;  %v796_v47 = vld [vmem:[#allocation2 + $0x940] sm:$0xff]  ;;  %v798_v48 = vld [vmem:[#allocation2 + $0x950] sm:$0xff] }
  0x98   :  { %402 = vmatmul.mubr.f32.gmra.mxu0 %v1431_v49  ;;  %509 = vmatmul.mubr.f32.gmra.mxu1 %v1431_v49 }
  0x99   :  { %578 = vmatpush2.msra.mxu0 %v142_v50  ;;  %685 = vmatpush2.msra.mxu1 %v144_v51  ;;  %v793_v50 = vld [vmem:[#allocation2 + $0x928] sm:$0xff]  ;;  %v795_v51 = vld [vmem:[#allocation2 + $0x938] sm:$0xff] }
  0x9a   :  { %579 = vmatprep.subr.mxu0 %v139_v52  ;;  %686 = vmatprep.subr.mxu1 %v141_v53  ;;  %v792_v52 = vld [vmem:[#allocation2 + $0x920] sm:$0xff]  ;;  %v794_v53 = vld [vmem:[#allocation2 + $0x930] sm:$0xff] }
  0x9b   :  { %580 = vmatpush2.msra.mxu0 %v138_v54  ;;  %687 = vmatpush2.msra.mxu1 %v140_v55  ;;  %v789_v54 = vld [vmem:[#allocation2 + $0x908] sm:$0xff]  ;;  %v791_v55 = vld [vmem:[#allocation2 + $0x918] sm:$0xff] }
  0x9c   :  { %407 = vmatprep.mubr.f32.mxu0 %v1440_v56  ;;  %514 = vmatprep.mubr.f32.mxu1 %v1440_v56 }
  0x9d   :  { %581 = vmatprep.subr.mxu0 %v135_v57  ;;  %688 = vmatprep.subr.mxu1 %v137_v58  ;;  %v788_v57 = vld [vmem:[#allocation2 + $0x900] sm:$0xff]  ;;  %v790_v58 = vld [vmem:[#allocation2 + $0x910] sm:$0xff] }
  0x9e   :  { %408 = vmatmul.mubr.f32.gmra.mxu0 %v1445_v59  ;;  %515 = vmatmul.mubr.f32.gmra.mxu1 %v1445_v59 }
  0x9f   :  { %582 = vmatpush2.msra.mxu0 %v134_v60  ;;  %689 = vmatpush2.msra.mxu1 %v136_v61  ;;  %v785_v60 = vld [vmem:[#allocation2 + $0x8e8] sm:$0xff]  ;;  %v787_v61 = vld [vmem:[#allocation2 + $0x8f8] sm:$0xff] }
  0xa0   :  { %583 = vmatprep.subr.mxu0 %v131_v62  ;;  %690 = vmatprep.subr.mxu1 %v133_v0  ;;  %v784_v62 = vld [vmem:[#allocation2 + $0x8e0] sm:$0xff]  ;;  %v786_v0 = vld [vmem:[#allocation2 + $0x8f0] sm:$0xff] }
  0xa1   :  { %584 = vmatpush2.msra.mxu0 %v130_v2  ;;  %691 = vmatpush2.msra.mxu1 %v132_v3  ;;  %v781_v2 = vld [vmem:[#allocation2 + $0x8c8] sm:$0xff]  ;;  %v783_v3 = vld [vmem:[#allocation2 + $0x8d8] sm:$0xff] }
  0xa2   :  { %413 = vmatprep.mubr.f32.mxu0 %v1454_v4  ;;  %520 = vmatprep.mubr.f32.mxu1 %v1454_v4 }
  0xa3   :  { %585 = vmatprep.subr.mxu0 %v127_v5  ;;  %692 = vmatprep.subr.mxu1 %v129_v6  ;;  %v780_v5 = vld [vmem:[#allocation2 + $0x8c0] sm:$0xff]  ;;  %v782_v6 = vld [vmem:[#allocation2 + $0x8d0] sm:$0xff] }
  0xa4   :  { %414 = vmatmul.mubr.f32.gmra.mxu0 %v1459_v7  ;;  %521 = vmatmul.mubr.f32.gmra.mxu1 %v1459_v7 }
  0xa5   :  { %586 = vmatpush2.msra.mxu0 %v126_v8  ;;  %693 = vmatpush2.msra.mxu1 %v128_v9  ;;  %v777_v8 = vld [vmem:[#allocation2 + $0x8a8] sm:$0xff]  ;;  %v779_v9 = vld [vmem:[#allocation2 + $0x8b8] sm:$0xff] }
  0xa6   :  { %587 = vmatprep.subr.mxu0 %v123_v10  ;;  %694 = vmatprep.subr.mxu1 %v125_v11  ;;  %v776_v10 = vld [vmem:[#allocation2 + $0x8a0] sm:$0xff]  ;;  %v778_v11 = vld [vmem:[#allocation2 + $0x8b0] sm:$0xff] }
  0xa7   :  { %588 = vmatpush2.msra.mxu0 %v122_v12  ;;  %695 = vmatpush2.msra.mxu1 %v124_v13  ;;  %v773_v12 = vld [vmem:[#allocation2 + $0x888] sm:$0xff]  ;;  %v775_v13 = vld [vmem:[#allocation2 + $0x898] sm:$0xff] }
  0xa8   :  { %589 = vmatprep.subr.mxu0 %v119_v14  ;;  %696 = vmatprep.subr.mxu1 %v121_v15  ;;  %v772_v14 = vld [vmem:[#allocation2 + $0x880] sm:$0xff]  ;;  %v774_v15 = vld [vmem:[#allocation2 + $0x890] sm:$0xff] }
  0xa9   :  { %590 = vmatpush2.msra.mxu0 %v118_v17  ;;  %591 = vmatprep.mubr.f32.mxu0 %v41_v18  ;;  %v769_v17 = vld [vmem:[#allocation2 + $0x868] sm:$0xff] }
  0xaa   :  { %697 = vmatpush2.msra.mxu1 %v120_v20  ;;  %698 = vmatprep.mubr.f32.mxu1 %v41_v18  ;;  %v771_v18 = vld [vmem:[#allocation2 + $0x878] sm:$0xff]  ;;  %v768_v20 = vld [vmem:[#allocation2 + $0x860] sm:$0xff] }
  0xab   :  { %592 = vmatmul.mubr.f32.vlgmr.msra.gmra.mxu0 %v40_v21  ;;  %699 = vmatmul.mubr.f32.vlgmr.msra.gmra.mxu1 %v40_v21  ;;  %v770_v21 = vld [vmem:[#allocation2 + $0x870] sm:$0xff] }
  0xac   :  { %884 = vmatprep.subr.mxu0 %v817_v22  ;;  %991 = vmatprep.subr.mxu1 %v819_v23  ;;  %v765_v22 = vld [vmem:[#allocation2 + $0x848] sm:$0xff]  ;;  %v767_v23 = vld [vmem:[#allocation2 + $0x858] sm:$0xff] }
  0xad   :  { %885 = vmatpush1.msra.mxu0 %v816_v24  ;;  %992 = vmatpush1.msra.mxu1 %v818_v25  ;;  %v764_v24 = vld [vmem:[#allocation2 + $0x840] sm:$0xff]  ;;  %v766_v25 = vld [vmem:[#allocation2 + $0x850] sm:$0xff] }
  0xae   :  { %886 = vmatprep.subr.mxu0 %v813_v27  ;;  %993 = vmatprep.subr.mxu1 %v815_v28  ;;  %v761_v27 = vld [vmem:[#allocation2 + $0x828] sm:$0xff]  ;;  %v763_v28 = vld [vmem:[#allocation2 + $0x838] sm:$0xff] }
  0xaf   :  { %597 = vmatprep.mubr.f32.mxu0 %v1370_v63  ;;  %704 = vmatprep.mubr.f32.mxu1 %v1370_v63  ;;  %v801_v63 = vld [vmem:[#allocation2 + $0x968] sm:$0xff] }
  0xb0   :  { %887 = vmatpush1.msra.mxu0 %v812_v30  ;;  %994 = vmatpush1.msra.mxu1 %v814_v31  ;;  %v760_v30 = vld [vmem:[#allocation2 + $0x820] sm:$0xff]  ;;  %v762_v31 = vld [vmem:[#allocation2 + $0x830] sm:$0xff] }
  0xb1   :  { %598 = vmatmul.mubr.f32.gmra.mxu0 %v1375_v1  ;;  %705 = vmatmul.mubr.f32.gmra.mxu1 %v1375_v1  ;;  %v802_v1 = vld [vmem:[#allocation2 + $0x970] sm:$0xff] }
  0xb2   :  { %888 = vmatprep.subr.mxu0 %v809_v32  ;;  %995 = vmatprep.subr.mxu1 %v811_v33  ;;  %v757_v32 = vld [vmem:[#allocation2 + $0x808] sm:$0xff]  ;;  %v759_v33 = vld [vmem:[#allocation2 + $0x818] sm:$0xff] }
  0xb3   :  { %889 = vmatpush1.msra.mxu0 %v808_v34  ;;  %996 = vmatpush1.msra.mxu1 %v810_v35  ;;  %v756_v34 = vld [vmem:[#allocation2 + $0x800] sm:$0xff]  ;;  %v758_v35 = vld [vmem:[#allocation2 + $0x810] sm:$0xff] }
  0xb4   :  { %890 = vmatprep.subr.mxu0 %v805_v37  ;;  %997 = vmatprep.subr.mxu1 %v807_v38  ;;  %v881_v37 = vld [vmem:[#allocation2 + $0xbe8] sm:$0xff]  ;;  %v883_v38 = vld [vmem:[#allocation2 + $0xbf8] sm:$0xff] }
  0xb5   :  { %603 = vmatprep.mubr.f32.mxu0 %v1384_v16  ;;  %710 = vmatprep.mubr.f32.mxu1 %v1384_v16 }
  0xb6   :  { %891 = vmatpush1.msra.mxu0 %v804_v40  ;;  %998 = vmatpush1.msra.mxu1 %v806_v41  ;;  %v880_v40 = vld [vmem:[#allocation2 + $0xbe0] sm:$0xff]  ;;  %v882_v41 = vld [vmem:[#allocation2 + $0xbf0] sm:$0xff] }
  0xb7   :  { %604 = vmatmul.mubr.f32.gmra.mxu0 %v1389_v19  ;;  %711 = vmatmul.mubr.f32.gmra.mxu1 %v1389_v19 }
  0xb8   :  { %892 = vmatprep.subr.mxu0 %v801_v63  ;;  %999 = vmatprep.subr.mxu1 %v803_v42  ;;  %v877_v63 = vld [vmem:[#allocation2 + $0xbc8] sm:$0xff]  ;;  %v879_v42 = vld [vmem:[#allocation2 + $0xbd8] sm:$0xff] }
  0xb9   :  { %893 = vmatpush1.msra.mxu0 %v800_v43  ;;  %1000 = vmatpush1.msra.mxu1 %v802_v1  ;;  %v876_v43 = vld [vmem:[#allocation2 + $0xbc0] sm:$0xff]  ;;  %v878_v1 = vld [vmem:[#allocation2 + $0xbd0] sm:$0xff] }
  0xba   :  { %894 = vmatprep.subr.mxu0 %v797_v44  ;;  %1001 = vmatprep.subr.mxu1 %v799_v45  ;;  %v873_v44 = vld [vmem:[#allocation2 + $0xba8] sm:$0xff]  ;;  %v875_v45 = vld [vmem:[#allocation2 + $0xbb8] sm:$0xff] }
  0xbb   :  { %609 = vmatprep.mubr.f32.mxu0 %v1398_v26  ;;  %716 = vmatprep.mubr.f32.mxu1 %v1398_v26 }
  0xbc   :  { %895 = vmatpush1.msra.mxu0 %v796_v47  ;;  %1002 = vmatpush1.msra.mxu1 %v798_v48  ;;  %v872_v47 = vld [vmem:[#allocation2 + $0xba0] sm:$0xff]  ;;  %v874_v48 = vld [vmem:[#allocation2 + $0xbb0] sm:$0xff] }
  0xbd   :  { %610 = vmatmul.mubr.f32.gmra.mxu0 %v1403_v29  ;;  %717 = vmatmul.mubr.f32.gmra.mxu1 %v1403_v29 }
  0xbe   :  { %896 = vmatprep.subr.mxu0 %v793_v50  ;;  %1003 = vmatprep.subr.mxu1 %v795_v51  ;;  %v869_v50 = vld [vmem:[#allocation2 + $0xb88] sm:$0xff]  ;;  %v871_v51 = vld [vmem:[#allocation2 + $0xb98] sm:$0xff] }
  0xbf   :  { %897 = vmatpush1.msra.mxu0 %v792_v52  ;;  %1004 = vmatpush1.msra.mxu1 %v794_v53  ;;  %v868_v52 = vld [vmem:[#allocation2 + $0xb80] sm:$0xff]  ;;  %v870_v53 = vld [vmem:[#allocation2 + $0xb90] sm:$0xff] }
  0xc0   :  { %898 = vmatprep.subr.mxu0 %v789_v54  ;;  %1005 = vmatprep.subr.mxu1 %v791_v55  ;;  %v865_v54 = vld [vmem:[#allocation2 + $0xb68] sm:$0xff]  ;;  %v867_v55 = vld [vmem:[#allocation2 + $0xb78] sm:$0xff] }
  0xc1   :  { %615 = vmatprep.mubr.f32.mxu0 %v1412_v36  ;;  %722 = vmatprep.mubr.f32.mxu1 %v1412_v36 }
  0xc2   :  { %899 = vmatpush1.msra.mxu0 %v788_v57  ;;  %1006 = vmatpush1.msra.mxu1 %v790_v58  ;;  %v864_v57 = vld [vmem:[#allocation2 + $0xb60] sm:$0xff]  ;;  %v866_v58 = vld [vmem:[#allocation2 + $0xb70] sm:$0xff] }
  0xc3   :  { %616 = vmatmul.mubr.f32.gmra.mxu0 %v1417_v39  ;;  %723 = vmatmul.mubr.f32.gmra.mxu1 %v1417_v39 }
  0xc4   :  { %900 = vmatprep.subr.mxu0 %v785_v60  ;;  %1007 = vmatprep.subr.mxu1 %v787_v61  ;;  %v861_v60 = vld [vmem:[#allocation2 + $0xb48] sm:$0xff]  ;;  %v863_v61 = vld [vmem:[#allocation2 + $0xb58] sm:$0xff] }
  0xc5   :  { %901 = vmatpush1.msra.mxu0 %v784_v62  ;;  %1008 = vmatpush1.msra.mxu1 %v786_v0  ;;  %v860_v62 = vld [vmem:[#allocation2 + $0xb40] sm:$0xff]  ;;  %v862_v0 = vld [vmem:[#allocation2 + $0xb50] sm:$0xff] }
  0xc6   :  { %902 = vmatprep.subr.mxu0 %v781_v2  ;;  %1009 = vmatprep.subr.mxu1 %v783_v3  ;;  %v857_v2 = vld [vmem:[#allocation2 + $0xb28] sm:$0xff]  ;;  %v859_v3 = vld [vmem:[#allocation2 + $0xb38] sm:$0xff] }
  0xc7   :  { %621 = vmatprep.mubr.f32.mxu0 %v1426_v46  ;;  %728 = vmatprep.mubr.f32.mxu1 %v1426_v46 }
  0xc8   :  { %903 = vmatpush1.msra.mxu0 %v780_v5  ;;  %1010 = vmatpush1.msra.mxu1 %v782_v6  ;;  %v856_v5 = vld [vmem:[#allocation2 + $0xb20] sm:$0xff]  ;;  %v858_v6 = vld [vmem:[#allocation2 + $0xb30] sm:$0xff] }
  0xc9   :  { %622 = vmatmul.mubr.f32.gmra.mxu0 %v1431_v49  ;;  %729 = vmatmul.mubr.f32.gmra.mxu1 %v1431_v49 }
  0xca   :  { %904 = vmatprep.subr.mxu0 %v777_v8  ;;  %1011 = vmatprep.subr.mxu1 %v779_v9  ;;  %v853_v8 = vld [vmem:[#allocation2 + $0xb08] sm:$0xff]  ;;  %v855_v9 = vld [vmem:[#allocation2 + $0xb18] sm:$0xff] }
  0xcb   :  { %905 = vmatpush1.msra.mxu0 %v776_v10  ;;  %1012 = vmatpush1.msra.mxu1 %v778_v11  ;;  %v852_v10 = vld [vmem:[#allocation2 + $0xb00] sm:$0xff]  ;;  %v854_v11 = vld [vmem:[#allocation2 + $0xb10] sm:$0xff] }
  0xcc   :  { %906 = vmatprep.subr.mxu0 %v773_v12  ;;  %1013 = vmatprep.subr.mxu1 %v775_v13  ;;  %v849_v12 = vld [vmem:[#allocation2 + $0xae8] sm:$0xff]  ;;  %v851_v13 = vld [vmem:[#allocation2 + $0xaf8] sm:$0xff] }
  0xcd   :  { %627 = vmatprep.mubr.f32.mxu0 %v1440_v56  ;;  %734 = vmatprep.mubr.f32.mxu1 %v1440_v56 }
  0xce   :  { %907 = vmatpush1.msra.mxu0 %v772_v14  ;;  %1014 = vmatpush1.msra.mxu1 %v774_v15  ;;  %v848_v14 = vld [vmem:[#allocation2 + $0xae0] sm:$0xff]  ;;  %v850_v15 = vld [vmem:[#allocation2 + $0xaf0] sm:$0xff] }
  0xcf   :  { %628 = vmatmul.mubr.f32.gmra.mxu0 %v1445_v59  ;;  %735 = vmatmul.mubr.f32.gmra.mxu1 %v1445_v59 }
  0xd0   :  { %908 = vmatprep.subr.mxu0 %v769_v17  ;;  %1015 = vmatprep.subr.mxu1 %v771_v18  ;;  %v845_v17 = vld [vmem:[#allocation2 + $0xac8] sm:$0xff]  ;;  %v847_v18 = vld [vmem:[#allocation2 + $0xad8] sm:$0xff] }
  0xd1   :  { %909 = vmatpush1.msra.mxu0 %v768_v20  ;;  %1016 = vmatpush1.msra.mxu1 %v770_v21  ;;  %v844_v20 = vld [vmem:[#allocation2 + $0xac0] sm:$0xff]  ;;  %v846_v21 = vld [vmem:[#allocation2 + $0xad0] sm:$0xff] }
  0xd2   :  { %910 = vmatprep.subr.mxu0 %v765_v22  ;;  %1017 = vmatprep.subr.mxu1 %v767_v23  ;;  %v841_v22 = vld [vmem:[#allocation2 + $0xaa8] sm:$0xff]  ;;  %v843_v23 = vld [vmem:[#allocation2 + $0xab8] sm:$0xff] }
  0xd3   :  { %911 = vmatpush1.msra.mxu0 %v764_v24  ;;  %1018 = vmatpush1.msra.mxu1 %v766_v25  ;;  %v840_v24 = vld [vmem:[#allocation2 + $0xaa0] sm:$0xff]  ;;  %v842_v25 = vld [vmem:[#allocation2 + $0xab0] sm:$0xff] }
  0xd4   :  { %912 = vmatprep.subr.mxu0 %v761_v27  ;;  %1019 = vmatprep.subr.mxu1 %v763_v28  ;;  %v837_v27 = vld [vmem:[#allocation2 + $0xa88] sm:$0xff]  ;;  %v839_v28 = vld [vmem:[#allocation2 + $0xa98] sm:$0xff] }
  0xd5   :  { %913 = vmatpush1.msra.mxu0 %v760_v30  ;;  %1020 = vmatpush1.msra.mxu1 %v762_v31  ;;  %v836_v30 = vld [vmem:[#allocation2 + $0xa80] sm:$0xff]  ;;  %v838_v31 = vld [vmem:[#allocation2 + $0xa90] sm:$0xff] }
  0xd6   :  { %914 = vmatprep.subr.mxu0 %v757_v32  ;;  %1021 = vmatprep.subr.mxu1 %v759_v33  ;;  %v833_v32 = vld [vmem:[#allocation2 + $0xa68] sm:$0xff]  ;;  %v835_v33 = vld [vmem:[#allocation2 + $0xa78] sm:$0xff] }
  0xd7   :  { %915 = vmatpush1.msra.mxu0 %v756_v34  ;;  %1022 = vmatpush1.msra.mxu1 %v758_v35  ;;  %v832_v34 = vld [vmem:[#allocation2 + $0xa60] sm:$0xff]  ;;  %v834_v35 = vld [vmem:[#allocation2 + $0xa70] sm:$0xff] }
  0xd8   :  { %916 = vmatprep.subr.mxu0 %v881_v37  ;;  %1023 = vmatprep.subr.mxu1 %v883_v38  ;;  %v829_v37 = vld [vmem:[#allocation2 + $0xa48] sm:$0xff]  ;;  %v831_v38 = vld [vmem:[#allocation2 + $0xa58] sm:$0xff] }
  0xd9   :  { %917 = vmatpush2.msra.mxu0 %v880_v40  ;;  %1024 = vmatpush2.msra.mxu1 %v882_v41  ;;  %v828_v40 = vld [vmem:[#allocation2 + $0xa40] sm:$0xff]  ;;  %v830_v41 = vld [vmem:[#allocation2 + $0xa50] sm:$0xff] }
  0xda   :  { %918 = vmatprep.subr.mxu0 %v877_v63  ;;  %1025 = vmatprep.subr.mxu1 %v879_v42  ;;  %v825_v63 = vld [vmem:[#allocation2 + $0xa28] sm:$0xff]  ;;  %v827_v42 = vld [vmem:[#allocation2 + $0xa38] sm:$0xff] }
  0xdb   :  { %919 = vmatpush2.msra.mxu0 %v876_v43  ;;  %1026 = vmatpush2.msra.mxu1 %v878_v1  ;;  %v824_v43 = vld [vmem:[#allocation2 + $0xa20] sm:$0xff]  ;;  %v826_v1 = vld [vmem:[#allocation2 + $0xa30] sm:$0xff] }
  0xdc   :  { %920 = vmatprep.subr.mxu0 %v873_v44  ;;  %1027 = vmatprep.subr.mxu1 %v875_v45  ;;  %v821_v44 = vld [vmem:[#allocation2 + $0xa08] sm:$0xff]  ;;  %v823_v45 = vld [vmem:[#allocation2 + $0xa18] sm:$0xff] }
  0xdd   :  { %921 = vmatpush2.msra.mxu0 %v872_v47  ;;  %1028 = vmatpush2.msra.mxu1 %v874_v48  ;;  %v820_v47 = vld [vmem:[#allocation2 + $0xa00] sm:$0xff]  ;;  %v822_v48 = vld [vmem:[#allocation2 + $0xa10] sm:$0xff] }
  0xde   :  { %922 = vmatprep.subr.mxu0 %v869_v50  ;;  %1029 = vmatprep.subr.mxu1 %v871_v51 }
  0xdf   :  { %923 = vmatpush2.msra.mxu0 %v868_v52  ;;  %1030 = vmatpush2.msra.mxu1 %v870_v53 }
  0xe0   :  { %924 = vmatprep.subr.mxu0 %v865_v54  ;;  %1031 = vmatprep.subr.mxu1 %v867_v55 }
  0xe1   :  { %925 = vmatpush2.msra.mxu0 %v864_v57  ;;  %1032 = vmatpush2.msra.mxu1 %v866_v58 }
  0xe2   :  { %926 = vmatprep.subr.mxu0 %v861_v60  ;;  %1033 = vmatprep.subr.mxu1 %v863_v61 }
  0xe3   :  { %927 = vmatpush2.msra.mxu0 %v860_v62  ;;  %1034 = vmatpush2.msra.mxu1 %v862_v0 }
  0xe4   :  { %928 = vmatprep.subr.mxu0 %v857_v2  ;;  %1035 = vmatprep.subr.mxu1 %v859_v3 }
  0xe5   :  { %929 = vmatpush2.msra.mxu0 %v856_v5  ;;  %1036 = vmatpush2.msra.mxu1 %v858_v6 }
  0xe6   :  { %930 = vmatprep.subr.mxu0 %v853_v8  ;;  %1037 = vmatprep.subr.mxu1 %v855_v9 }
  0xe7   :  { %931 = vmatpush2.msra.mxu0 %v852_v10  ;;  %1038 = vmatpush2.msra.mxu1 %v854_v11 }
  0xe8   :  { %932 = vmatprep.subr.mxu0 %v849_v12  ;;  %1039 = vmatprep.subr.mxu1 %v851_v13 }
  0xe9   :  { %933 = vmatpush2.msra.mxu0 %v848_v14  ;;  %1040 = vmatpush2.msra.mxu1 %v850_v15 }
  0xea   :  { %934 = vmatprep.subr.mxu0 %v845_v17  ;;  %1041 = vmatprep.subr.mxu1 %v847_v18 }
  0xeb   :  { %935 = vmatpush2.msra.mxu0 %v844_v20  ;;  %1042 = vmatpush2.msra.mxu1 %v846_v21 }
  0xec   :  { %936 = vmatprep.subr.mxu0 %v841_v22  ;;  %1043 = vmatprep.subr.mxu1 %v843_v23 }
  0xed   :  { %937 = vmatpush2.msra.mxu0 %v840_v24  ;;  %1044 = vmatpush2.msra.mxu1 %v842_v25 }
  0xee   :  { %938 = vmatprep.subr.mxu0 %v837_v27  ;;  %1045 = vmatprep.subr.mxu1 %v839_v28 }
  0xef   :  { %939 = vmatpush2.msra.mxu0 %v836_v30  ;;  %1046 = vmatpush2.msra.mxu1 %v838_v31 }
  0xf0   :  { %940 = vmatprep.subr.mxu0 %v833_v32  ;;  %1047 = vmatprep.subr.mxu1 %v835_v33 }
  0xf1   :  { %941 = vmatpush2.msra.mxu0 %v832_v34  ;;  %1048 = vmatpush2.msra.mxu1 %v834_v35  ;;  %v1130_v34 = vlaneseq }
  0xf2   :  { %942 = vmatprep.subr.mxu0 %v829_v37  ;;  %1049 = vmatprep.subr.mxu1 %v831_v38 }
  0xf3   :  { %943 = vmatpush2.msra.mxu0 %v828_v40  ;;  %1050 = vmatpush2.msra.mxu1 %v830_v41  ;;  %v1131_v38 = vshrl.u32 %v1130_v34, 7 }
  0xf4   :  { %944 = vmatprep.subr.mxu0 %v825_v63  ;;  %1051 = vmatprep.subr.mxu1 %v827_v42  ;;  %v1126_v63 = vld [vmem:[#allocation4] ss:$2 sm:$0xf] }
  0xf5   :  { %945 = vmatpush2.msra.mxu0 %v824_v43  ;;  %1052 = vmatpush2.msra.mxu1 %v826_v1  ;;  %v1132_v42 = vsub.s32 0, %v1131_v38  ;;  %v1140_v43 = vsub.s32 2, %v1131_v38  ;;  %v1128_v1 = vld [vmem:[#allocation4 + $0x1] ss:$2 sm:$0xf] }
  0xf6   :  { %946 = vmatprep.subr.mxu0 %v821_v44  ;;  %1053 = vmatprep.subr.mxu1 %v823_v45  ;;  %v1136_v44 = vsub.s32 1, %v1131_v38  ;;  %v1144_v45 = vsub.s32 3, %v1131_v38 }
  0xf7   :  { %947 = vmatpush2.msra.mxu0 %v820_v47  ;;  %948 = vmatprep.mubr.f32.mxu0 %v1384_v16 }
  0xf8   :  { %1054 = vmatpush2.msra.mxu1 %v822_v48  ;;  %1055 = vmatprep.mubr.f32.mxu1 %v1384_v16  ;;  %v754_v16 = vld [vmem:[%s1831_s0 + $0x88] sm:$0xff]  ;;  %v1591_v34 = vrot.slane %v1128_v1, %v1136_v44 }
  0xf9   :  { %949 = vmatmul.mubr.f32.vlgmr.msra.gmra.mxu0 %v1389_v19  ;;  %1056 = vmatmul.mubr.f32.vlgmr.msra.gmra.mxu1 %v1389_v19  ;;  %v753_v19 = vld [vmem:[%s1831_s0 + $0x80] sm:$0xff] }
  0xfa   :  { %954 = vmatprep.mubr.f32.mxu0 %v1398_v26  ;;  %1061 = vmatprep.mubr.f32.mxu1 %v1398_v26 }
  0xfd   :  { %955 = vmatmul.mubr.f32.gmra.mxu0 %v1403_v29  ;;  %1062 = vmatmul.mubr.f32.gmra.mxu1 %v1403_v29 }
  0xfe   :  { %960 = vmatprep.mubr.f32.mxu0 %v1412_v36  ;;  %1067 = vmatprep.mubr.f32.mxu1 %v1412_v36 }
 0x101   :  { %961 = vmatmul.mubr.f32.gmra.mxu0 %v1417_v39  ;;  %1068 = vmatmul.mubr.f32.gmra.mxu1 %v1417_v39 }
 0x102   :  { %966 = vmatprep.mubr.f32.mxu0 %v1426_v46  ;;  %1073 = vmatprep.mubr.f32.mxu1 %v1426_v46 }
 0x105   :  { %967 = vmatmul.mubr.f32.gmra.mxu0 %v1431_v49  ;;  %1074 = vmatmul.mubr.f32.gmra.mxu1 %v1431_v49 }
 0x106   :  { %972 = vmatprep.mubr.f32.mxu0 %v1440_v56  ;;  %1079 = vmatprep.mubr.f32.mxu1 %v1440_v56 }
 0x109   :  { %973 = vmatmul.mubr.f32.gmra.mxu0 %v1445_v59  ;;  %1080 = vmatmul.mubr.f32.gmra.mxu1 %v1445_v59 }
 0x10a   :  { %978 = vmatprep.mubr.f32.mxu0 %v1454_v4  ;;  %1085 = vmatprep.mubr.f32.mxu1 %v1454_v4 }
 0x10d   :  { %979 = vmatmul.mubr.f32.gmra.mxu0 %v1459_v7  ;;  %1086 = vmatmul.mubr.f32.gmra.mxu1 %v1459_v7 }
 0x10e   :  { %984 = vmatprep.mubr.f32.mxu0 %v754_v16  ;;  %1091 = vmatprep.mubr.f32.mxu1 %v754_v16  ;;  %v1581_v16 = vrot.slane %v1126_v63, %v1132_v42 }
 0x110   :  { %1845 = vst [vmem:[#allocation14_spill] sm:$0xff] %v1581_v16 }
 0x111   :  { %985 = vmatmul.mubr.f32.gmra.mxu0 %v753_v19  ;;  %1092 = vmatmul.mubr.f32.gmra.mxu1 %v753_v19  ;;  %v1583_v19 = vrot.slane %v1128_v1, %v1132_v42 }
 0x11d   :  { %v1525_v26 = vpop.f32.mrf.mxu0  ;;  %v1527_v29 = vpop.f32.mrf.mxu1 }
 0x11f   :  { %v1529_v36 = vpop.f32.mrf.mxu0  ;;  %v1531_v39 = vpop.f32.mrf.mxu1 }
 0x146   :  { %v1533_v46 = vpop.f32.mrf.mxu0  ;;  %v1535_v49 = vpop.f32.mrf.mxu1 }
 0x148   :  { %v1537_v56 = vpop.f32.mrf.mxu0  ;;  %v1539_v59 = vpop.f32.mrf.mxu1 }
 0x14c   :  { %v1541_v4 = vpop.f32.mrf.mxu0  ;;  %v1543_v7 = vpop.f32.mrf.mxu1 }
 0x14e   :  { %v1545_v50 = vpop.f32.mrf.mxu0  ;;  %v1547_v51 = vpop.f32.mrf.mxu1 }
 0x152   :  { %v1549_v52 = vpop.f32.mrf.mxu0  ;;  %v1551_v53 = vpop.f32.mrf.mxu1 }
 0x154   :  { %v1553_v54 = vpop.f32.mrf.mxu0  ;;  %v1555_v55 = vpop.f32.mrf.mxu1 }
 0x158   :  { %v1557_v57 = vpop.f32.mrf.mxu0  ;;  %v1559_v58 = vpop.f32.mrf.mxu1 }
 0x15a   :  { %v1561_v60 = vpop.f32.mrf.mxu0  ;;  %v1563_v61 = vpop.f32.mrf.mxu1 }
 0x15e   :  { %v1565_v62 = vpop.f32.mrf.mxu0  ;;  %v1567_v0 = vpop.f32.mrf.mxu1 }
 0x160   :  { %v1569_v2 = vpop.f32.mrf.mxu0  ;;  %v1571_v3 = vpop.f32.mrf.mxu1 }
 0x161   :  { %1839 = vst [vmem:[#allocation8_spill] sm:$0xff] %v1569_v2  ;;  %1840 = vst [vmem:[#allocation9_spill] sm:$0xff] %v1571_v3  ;;  %v1595_v3 = vrot.slane %v1128_v1, %v1144_v45 }
 0x164   :  { %v1573_v5 = vpop.f32.mrf.mxu0  ;;  %v1575_v6 = vpop.f32.mrf.mxu1 }
 0x165   :  { %1841 = vst [vmem:[#allocation10_spill] sm:$0xff] %v1573_v5  ;;  %1842 = vst [vmem:[#allocation11_spill] sm:$0xff] %v1575_v6  ;;  %v1589_v6 = vrot.slane %v1126_v63, %v1136_v44  ;;  %v1593_v5 = vrot.slane %v1126_v63, %v1144_v45 }
 0x166   :  { %v1577_v8 = vpop.f32.mrf.mxu0  ;;  %v1579_v9 = vpop.f32.mrf.mxu1 }
 0x167   :  { %1843 = vst [vmem:[#allocation12_spill] sm:$0xff] %v1577_v8  ;;  %1844 = vst [vmem:[#allocation13_spill] sm:$0xff] %v1579_v9  ;;  %v1585_v9 = vrot.slane %v1126_v63, %v1140_v43  ;;  %v1587_v8 = vrot.slane %v1128_v1, %v1140_v43 }
 0x168   :  { %1847 = vst [vmem:[#allocation16_spill] sm:$0xff] %v1589_v6  ;;  %1848 = vst [vmem:[#allocation17_spill] sm:$0xff] %v1593_v5 }
 0x169   :  { %1846 = vst [vmem:[#allocation15_spill] sm:$0xff] %v1585_v9 }
 0x16b   :  { %v593_v10 = vpop.f32.mrf.mxu0  ;;  %v700_v11 = vpop.f32.mrf.mxu1 }
 0x16c   :  { %v594_v38 = vadd.f32 %v593_v10, %v1525_v26  ;;  %v701_v2 = vadd.f32 %v700_v11, %v1527_v29 }
 0x16d   :  { %v595_v12 = vpop.f32.mrf.mxu0  ;;  %v702_v13 = vpop.f32.mrf.mxu1 }
 0x16e   :  { %v596_v16 = vadd.f32 %v595_v12, %v1529_v36  ;;  %v703_v42 = vadd.f32 %v702_v13, %v1531_v39  ;;  %v1849_v12 = vld [vmem:[#allocation8_spill] sm:$0xff] }
 0x16f   :  { %v1858_v45 = vld [vmem:[#allocation17_spill] sm:$0xff] }
 0x171   :  { %v599_v14 = vpop.f32.mrf.mxu0  ;;  %v706_v15 = vpop.f32.mrf.mxu1 }
 0x172   :  { %v600_v9 = vadd.f32 %v599_v14, %v1533_v46  ;;  %v707_v43 = vadd.f32 %v706_v15, %v1535_v49 }
 0x173   :  { %v601_v17 = vpop.f32.mrf.mxu0  ;;  %v708_v18 = vpop.f32.mrf.mxu1 }
 0x174   :  { %v602_v6 = vadd.f32 %v601_v17, %v1537_v56  ;;  %v709_v44 = vadd.f32 %v708_v18, %v1539_v59 }
 0x177   :  { %v605_v20 = vpop.f32.mrf.mxu0  ;;  %v712_v21 = vpop.f32.mrf.mxu1 }
 0x178   :  { %v606_v1 = vadd.f32 %v605_v20, %v1541_v4  ;;  %v713_v26 = vadd.f32 %v712_v21, %v1543_v7 }
 0x179   :  { %v607_v22 = vpop.f32.mrf.mxu0  ;;  %v714_v23 = vpop.f32.mrf.mxu1 }
 0x17a   :  { %v1608_v29 = vadd.f32 %v607_v22, %v1545_v50  ;;  %v1611_v36 = vadd.f32 %v714_v23, %v1547_v51 }
 0x17d   :  { %v611_v24 = vpop.f32.mrf.mxu0  ;;  %v718_v25 = vpop.f32.mrf.mxu1 }
 0x17e   :  { %v1614_v39 = vadd.f32 %v611_v24, %v1549_v52  ;;  %v1617_v46 = vadd.f32 %v718_v25, %v1551_v53  ;;  %v1855_v24 = vld [vmem:[#allocation14_spill] sm:$0xff] }
 0x17f   :  { %v613_v27 = vpop.f32.mrf.mxu0  ;;  %v720_v28 = vpop.f32.mrf.mxu1 }
 0x180   :  { %v1620_v49 = vadd.f32 %v613_v27, %v1553_v54  ;;  %v1623_v56 = vadd.f32 %v720_v28, %v1555_v55 }
 0x183   :  { %v617_v30 = vpop.f32.mrf.mxu0  ;;  %v724_v31 = vpop.f32.mrf.mxu1 }
 0x184   :  { %v1626_v7 = vadd.f32 %v617_v30, %v1557_v57  ;;  %v1629_v50 = vadd.f32 %v724_v31, %v1559_v58  ;;  %v1850_v58 = vld [vmem:[#allocation9_spill] sm:$0xff]  ;;  %v1856_v31 = vld [vmem:[#allocation15_spill] sm:$0xff] }
 0x185   :  { %v619_v32 = vpop.f32.mrf.mxu0  ;;  %v726_v33 = vpop.f32.mrf.mxu1 }
 0x186   :  { %v1632_v51 = vadd.f32 %v619_v32, %v1561_v60  ;;  %v1635_v53 = vadd.f32 %v726_v33, %v1563_v61  ;;  %v1851_v60 = vld [vmem:[#allocation10_spill] sm:$0xff]  ;;  %v1852_v61 = vld [vmem:[#allocation11_spill] sm:$0xff] }
 0x189   :  { %v623_v35 = vpop.f32.mrf.mxu0  ;;  %v730_v37 = vpop.f32.mrf.mxu1 }
 0x18a   :  { %v1638_v54 = vadd.f32 %v623_v35, %v1565_v62  ;;  %v1641_v55 = vadd.f32 %v730_v37, %v1567_v0  ;;  %v1853_v62 = vld [vmem:[#allocation12_spill] sm:$0xff]  ;;  %v1854_v0 = vld [vmem:[#allocation13_spill] sm:$0xff] }
 0x18b   :  { %v625_v40 = vpop.f32.mrf.mxu0  ;;  %v732_v41 = vpop.f32.mrf.mxu1  ;;  %v1857_v35 = vld [vmem:[#allocation16_spill] sm:$0xff] }
 0x18c   :  { %v1644_v13 = vadd.f32 %v625_v40, %v1849_v12  ;;  %v1647_v14 = vadd.f32 %v732_v41, %v1850_v58 }
 0x18f   :  { %v629_v47 = vpop.f32.mrf.mxu0  ;;  %v736_v48 = vpop.f32.mrf.mxu1 }
 0x190   :  { %v1650_v15 = vadd.f32 %v629_v47, %v1851_v60  ;;  %v1653_v17 = vadd.f32 %v736_v48, %v1852_v61 }
 0x191   :  { %v631_v63 = vpop.f32.mrf.mxu0  ;;  %v738_v5 = vpop.f32.mrf.mxu1 }
 0x192   :  { %v1656_v18 = vadd.f32 %v631_v63, %v1853_v62  ;;  %v1659_v20 = vadd.f32 %v738_v5, %v1854_v0 }
 0x1b9   :  { %v950_v59 = vpop.f32.mrf.mxu0  ;;  %v1057_v4 = vpop.f32.mrf.mxu1 }
 0x1ba   :  { %v1098_v52 = vadd.f32 %v950_v59, %v594_v38  ;;  %v1100_v10 = vadd.f32 %v1057_v4, %v701_v2 }
 0x1bb   :  { %v952_v11 = vpop.f32.mrf.mxu0  ;;  %v1059_v57 = vpop.f32.mrf.mxu1 }
 0x1bc   :  { %v1099_v2 = vadd.f32 %v952_v11, %v596_v16  ;;  %v1101_v21 = vadd.f32 %v1059_v57, %v703_v42  ;;  %v1662_v25 = vmul.f32 %v1855_v24, %v1098_v52  ;;  %v1203_v27 = vmul.f32 %v1583_v19, %v1098_v52 }
 0x1bd   :  { %v956_v22 = vpop.f32.mrf.mxu0  ;;  %v1063_v23 = vpop.f32.mrf.mxu1  ;;  %v1666_v32 = vmul.f32 %v1856_v31, %v1100_v10  ;;  %v1205_v33 = vmul.f32 %v1587_v8, %v1100_v10 }
 0x1be   :  { %v1102_v28 = vadd.f32 %v956_v22, %v600_v9  ;;  %v1104_v30 = vadd.f32 %v1063_v23, %v707_v43  ;;  %v1670_v37 = vmul.f32 %v1857_v35, %v1099_v2  ;;  %v1204_v5 = vmul.f32 %v1591_v34, %v1099_v2 }
 0x1bf   :  { %v958_v40 = vpop.f32.mrf.mxu0  ;;  %v1065_v41 = vpop.f32.mrf.mxu1  ;;  %v1674_v47 = vmul.f32 %v1858_v45, %v1101_v21  ;;  %v1206_v48 = vmul.f32 %v1595_v3, %v1101_v21 }
 0x1c0   :  { %v1154_v9 = vmul.f32 %v1855_v24, %v1102_v28  ;;  %v1156_v16 = vmul.f32 %v1856_v31, %v1104_v30  ;;  %v1207_v38 = vmul.f32 %v1583_v19, %v1102_v28  ;;  %v1209_v42 = vmul.f32 %v1587_v8, %v1104_v30 }
 0x1c1   :  { %v1103_v43 = vadd.f32 %v958_v40, %v602_v6  ;;  %v1105_v63 = vadd.f32 %v1065_v41, %v709_v44  ;;  %v962_v59 = vpop.f32.mrf.mxu0  ;;  %v1069_v4 = vpop.f32.mrf.mxu1 }
 0x1c2   :  { %v1231_v52 = vadd.f32 %v1203_v27, %v1154_v9  ;;  %v1233_v10 = vadd.f32 %v1205_v33, %v1156_v16  ;;  %v1106_v11 = vadd.f32 %v962_v59, %v606_v1  ;;  %v1108_v57 = vadd.f32 %v1069_v4, %v713_v26 }
 0x1c3   :  { %v1155_v12 = vmul.f32 %v1857_v35, %v1103_v43  ;;  %v1208_v58 = vmul.f32 %v1591_v34, %v1103_v43  ;;  %v1157_v60 = vmul.f32 %v1858_v45, %v1105_v63  ;;  %v1210_v61 = vmul.f32 %v1595_v3, %v1105_v63  ;;  %v964_v62 = vpop.f32.mrf.mxu0  ;;  %v1071_v0 = vpop.f32.mrf.mxu1 }
 0x1c4   :  { %1259 = vst [vmem:[%s1834_s3 + $0x20] sm:$0xff] %v1231_v52  ;;  %1261 = vst [vmem:[%s1834_s3 + $0x30] sm:$0xff] %v1233_v10  ;;  %v1158_v6 = vmul.f32 %v1855_v24, %v1106_v11  ;;  %v1211_v44 = vmul.f32 %v1583_v19, %v1106_v11  ;;  %v1160_v1 = vmul.f32 %v1856_v31, %v1108_v57 }
 0x1c5   :  { %v1213_v26 = vmul.f32 %v1587_v8, %v1108_v57  ;;  %v1232_v2 = vadd.f32 %v1204_v5, %v1155_v12  ;;  %v1234_v21 = vadd.f32 %v1206_v48, %v1157_v60  ;;  %v1107_v22 = vadd.f32 %v964_v62, %v1608_v29  ;;  %v968_v27 = vpop.f32.mrf.mxu0  ;;  %v1075_v28 = vpop.f32.mrf.mxu1 }
 0x1c6   :  { %v1109_v23 = vadd.f32 %v1071_v0, %v1611_v36  ;;  %v1235_v30 = vadd.f32 %v1207_v38, %v1158_v6  ;;  %v1237_v33 = vadd.f32 %v1209_v42, %v1160_v1  ;;  %v1110_v40 = vadd.f32 %v968_v27, %v1614_v39 }
 0x1c7   :  { %v1112_v41 = vadd.f32 %v1075_v28, %v1617_v46  ;;  %1260 = vst [vmem:[%s1834_s3 + $0x28] sm:$0xff] %v1232_v2  ;;  %1262 = vst [vmem:[%s1834_s3 + $0x38] sm:$0xff] %v1234_v21  ;;  %v1159_v29 = vmul.f32 %v1857_v35, %v1107_v22  ;;  %v1212_v36 = vmul.f32 %v1591_v34, %v1107_v22  ;;  %v970_v9 = vpop.f32.mrf.mxu0  ;;  %v1077_v39 = vpop.f32.mrf.mxu1 }
 0x1c8   :  { %v1161_v5 = vmul.f32 %v1858_v45, %v1109_v23  ;;  %v1214_v48 = vmul.f32 %v1595_v3, %v1109_v23  ;;  %1263 = vst [vmem:[%s1834_s3 + $0x40] sm:$0xff] %v1235_v30  ;;  %1265 = vst [vmem:[%s1834_s3 + $0x50] sm:$0xff] %v1237_v33  ;;  %v1162_v46 = vmul.f32 %v1855_v24, %v1110_v40 }
 0x1c9   :  { %v1215_v16 = vmul.f32 %v1583_v19, %v1110_v40  ;;  %v1164_v38 = vmul.f32 %v1856_v31, %v1112_v41  ;;  %v1217_v42 = vmul.f32 %v1587_v8, %v1112_v41  ;;  %v1236_v43 = vadd.f32 %v1208_v58, %v1159_v29  ;;  %v974_v52 = vpop.f32.mrf.mxu0  ;;  %v1081_v10 = vpop.f32.mrf.mxu1 }
 0x1ca   :  { %v1238_v63 = vadd.f32 %v1210_v61, %v1161_v5  ;;  %v1111_v59 = vadd.f32 %v970_v9, %v1620_v49  ;;  %v1113_v4 = vadd.f32 %v1077_v39, %v1623_v56  ;;  %v1239_v11 = vadd.f32 %v1211_v44, %v1162_v46 }
 0x1cb   :  { %v1241_v57 = vadd.f32 %v1213_v26, %v1164_v38  ;;  %v1114_v12 = vadd.f32 %v974_v52, %v1626_v7  ;;  %v1116_v60 = vadd.f32 %v1081_v10, %v1629_v50  ;;  %1264 = vst [vmem:[%s1834_s3 + $0x48] sm:$0xff] %v1236_v43  ;;  %v976_v62 = vpop.f32.mrf.mxu0  ;;  %v1083_v7 = vpop.f32.mrf.mxu1 }
 0x1cc   :  { %1266 = vst [vmem:[%s1834_s3 + $0x58] sm:$0xff] %v1238_v63  ;;  %v1163_v49 = vmul.f32 %v1857_v35, %v1111_v59  ;;  %v1216_v56 = vmul.f32 %v1591_v34, %v1111_v59  ;;  %v1165_v58 = vmul.f32 %v1858_v45, %v1113_v4  ;;  %v1218_v61 = vmul.f32 %v1595_v3, %v1113_v4 }
 0x1cd   :  { %1267 = vst [vmem:[%s1834_s3 + $0x60] sm:$0xff] %v1239_v11  ;;  %1269 = vst [vmem:[%s1834_s3 + $0x70] sm:$0xff] %v1241_v57  ;;  %v1166_v50 = vmul.f32 %v1855_v24, %v1114_v12  ;;  %v1219_v0 = vmul.f32 %v1583_v19, %v1114_v12  ;;  %v1168_v6 = vmul.f32 %v1856_v31, %v1116_v60  ;;  %v980_v22 = vpop.f32.mrf.mxu0  ;;  %v1087_v23 = vpop.f32.mrf.mxu1 }
 0x1ce   :  { %v1221_v44 = vmul.f32 %v1587_v8, %v1116_v60  ;;  %v1240_v1 = vadd.f32 %v1212_v36, %v1163_v49  ;;  %v1242_v26 = vadd.f32 %v1214_v48, %v1165_v58  ;;  %v1115_v2 = vadd.f32 %v976_v62, %v1632_v51 }
 0x1cf   :  { %v1117_v21 = vadd.f32 %v1083_v7, %v1635_v53  ;;  %v1243_v27 = vadd.f32 %v1215_v16, %v1166_v50  ;;  %v1245_v28 = vadd.f32 %v1217_v42, %v1168_v6  ;;  %v1118_v30 = vadd.f32 %v980_v22, %v1638_v54  ;;  %v982_v29 = vpop.f32.mrf.mxu0  ;;  %v1089_v54 = vpop.f32.mrf.mxu1 }
 0x1d0   :  { %v1120_v33 = vadd.f32 %v1087_v23, %v1641_v55  ;;  %1268 = vst [vmem:[%s1834_s3 + $0x68] sm:$0xff] %v1240_v1  ;;  %1270 = vst [vmem:[%s1834_s3 + $0x78] sm:$0xff] %v1242_v26  ;;  %v1167_v51 = vmul.f32 %v1857_v35, %v1115_v2  ;;  %v1220_v53 = vmul.f32 %v1591_v34, %v1115_v2 }
 0x1d1   :  { %v1169_v40 = vmul.f32 %v1858_v45, %v1117_v21  ;;  %v1222_v41 = vmul.f32 %v1595_v3, %v1117_v21  ;;  %1271 = vst [vmem:[%s1834_s3 + $0x80] sm:$0xff] %v1243_v27  ;;  %1273 = vst [vmem:[%s1834_s3 + $0x90] sm:$0xff] %v1245_v28  ;;  %v1170_v55 = vmul.f32 %v1855_v24, %v1118_v30  ;;  %v986_v38 = vpop.f32.mrf.mxu0  ;;  %v1093_v42 = vpop.f32.mrf.mxu1 }
 0x1d2   :  { %v1223_v36 = vmul.f32 %v1583_v19, %v1118_v30  ;;  %v1172_v5 = vmul.f32 %v1856_v31, %v1120_v33  ;;  %v1225_v48 = vmul.f32 %v1587_v8, %v1120_v33  ;;  %v1244_v9 = vadd.f32 %v1216_v56, %v1167_v51 }
 0x1d3   :  { %v1246_v39 = vadd.f32 %v1218_v61, %v1169_v40  ;;  %v1119_v46 = vadd.f32 %v982_v29, %v1644_v13  ;;  %v1121_v16 = vadd.f32 %v1089_v54, %v1647_v14  ;;  %v1247_v43 = vadd.f32 %v1219_v0, %v1170_v55  ;;  %v988_v11 = vpop.f32.mrf.mxu0 }
 0x1d4   :  { %v1249_v63 = vadd.f32 %v1221_v44, %v1172_v5  ;;  %v1122_v59 = vadd.f32 %v986_v38, %v1650_v15  ;;  %v1124_v4 = vadd.f32 %v1093_v42, %v1653_v17  ;;  %1272 = vst [vmem:[%s1834_s3 + $0x88] sm:$0xff] %v1244_v9  ;;  %v1095_v15 = vpop.f32.mrf.mxu1  ;;  %v1123_v58 = vadd.f32 %v988_v11, %v1656_v18 }
 0x1d5   :  { %1274 = vst [vmem:[%s1834_s3 + $0x98] sm:$0xff] %v1246_v39  ;;  %v1171_v13 = vmul.f32 %v1857_v35, %v1119_v46  ;;  %v1224_v14 = vmul.f32 %v1591_v34, %v1119_v46  ;;  %v1173_v52 = vmul.f32 %v1858_v45, %v1121_v16  ;;  %v1226_v10 = vmul.f32 %v1595_v3, %v1121_v16 }
 0x1d6   :  { %1275 = vst [vmem:[%s1834_s3 + $0xa0] sm:$0xff] %v1247_v43  ;;  %1277 = vst [vmem:[%s1834_s3 + $0xb0] sm:$0xff] %v1249_v63  ;;  %v1174_v17 = vmul.f32 %v1855_v24, %v1122_v59  ;;  %v1199_v57 = vmul.f32 %v1583_v19, %v1122_v59  ;;  %v1176_v12 = vmul.f32 %v1856_v31, %v1124_v4 }
 0x1d7   :  { %v1201_v60 = vmul.f32 %v1587_v8, %v1124_v4  ;;  %v1248_v49 = vadd.f32 %v1220_v53, %v1171_v13  ;;  %v1250_v56 = vadd.f32 %v1222_v41, %v1173_v52  ;;  %v1125_v61 = vadd.f32 %v1095_v15, %v1659_v20 }
 0x1d8   :  { %v1227_v62 = vadd.f32 %v1199_v57, %v1662_v25  ;;  %v1251_v7 = vadd.f32 %v1223_v36, %v1174_v17  ;;  %v1253_v0 = vadd.f32 %v1225_v48, %v1176_v12  ;;  %v1175_v8 = vmul.f32 %v1857_v35, %v1123_v58 }
 0x1d9   :  { %v1229_v50 = vadd.f32 %v1201_v60, %v1666_v32  ;;  %1276 = vst [vmem:[%s1834_s3 + $0xa8] sm:$0xff] %v1248_v49  ;;  %1278 = vst [vmem:[%s1834_s3 + $0xb8] sm:$0xff] %v1250_v56  ;;  %v1200_v19 = vmul.f32 %v1591_v34, %v1123_v58  ;;  %v1177_v18 = vmul.f32 %v1858_v45, %v1125_v61 }
 0x1da   :  { %v1202_v20 = vmul.f32 %v1595_v3, %v1125_v61  ;;  %1255 = vst [vmem:[%s1834_s3] sm:$0xff] %v1227_v62  ;;  %1279 = vst [vmem:[%s1834_s3 + $0xc0] sm:$0xff] %v1251_v7  ;;  %v1252_v24 = vadd.f32 %v1224_v14, %v1175_v8 }
 0x1db   :  { %1257 = vst [vmem:[%s1834_s3 + $0x10] sm:$0xff] %v1229_v50  ;;  %1281 = vst [vmem:[%s1834_s3 + $0xd0] sm:$0xff] %v1253_v0  ;;  %v1228_v34 = vadd.f32 %v1200_v19, %v1670_v37  ;;  %v1254_v25 = vadd.f32 %v1226_v10, %v1177_v18 }
 0x1dc   :  { %v1230_v3 = vadd.f32 %v1202_v20, %v1674_v47  ;;  %1280 = vst [vmem:[%s1834_s3 + $0xc8] sm:$0xff] %v1252_v24 }
 0x1dd   :  { %1256 = vst [vmem:[%s1834_s3 + $0x8] sm:$0xff] %v1228_v34  ;;  %1282 = vst [vmem:[%s1834_s3 + $0xd8] sm:$0xff] %v1254_v25 }
 0x1de   :  { %1258 = vst [vmem:[%s1834_s3 + $0x18] sm:$0xff] %v1230_v3 }
 0x1df   :  { %1287 = vsyncpa [#allocation3], 1 }
 0x1e0   :  { %1288 = vsyncpa [#allocation5], 1 }

</bundles_post_ra>
